<compile_context>
chip_gen: v7x
topology: tpu7x:2x2x1
jax: 0.10.0
libtpu: 0.0.40
codegen_flags: <defaults>
</compile_context>

<pallas_src>
import functools

import jax
import jax.numpy as jnp
import numpy as np
from jax.experimental import pallas as pl
from jax.experimental.pallas import tpu as pltpu


def _phase_act_kernel(mean_ref, std_ref, pm_ref, xpe_ref, w_ref, eye_ref, out_ref,
                      *, n_phase, n_move, t_len, nn):
    """One batch element per grid step.

    xpe_ref : (P, T, N*N) VMEM  — phase one-hot channels; node axis pre-tiled so
              column i*N+j carries node j (everything lane-dense).
    w_ref   : (M, N*N)   VMEM  — movement-major gating table,
              w[m, i*N+j] = 1 iff edge (i, j) exists and requires movement m.
    eye_ref : (1, N*N)   VMEM  — flattened identity.
    mean_ref/std_ref : (P,) SMEM — re-normalization stats of the phase channels.
    pm_ref  : (P*M,)     SMEM — phase -> movement table, row-major.
    out_ref : (T, N*N)   VMEM — phase-activated adjacency, flattened (i, j).
    """
    # 1) re-normalize + binarize each phase channel: pure VPU on full-lane slabs.
    bits = []
    for p in range(n_phase):
        v = xpe_ref[p] * std_ref[p] + mean_ref[p]                    # (T, N*N)
        bits.append((jnp.abs(v - 1.0) < 1e-6).astype(jnp.float32))

    # 2) phase -> movement activation (scalar-broadcast FMAs, no MXU) and
    #    edge-movement gating accumulated as M leading-axis VPU FMAs.
    gate = None
    for m in range(n_move):
        a = bits[0] * pm_ref[0 * n_move + m]
        for p in range(1, n_phase):
            a = a + bits[p] * pm_ref[p * n_move + m]
        a = jnp.minimum(a, 1.0)         # keep clamp: exact reference semantics
        term = w_ref[m:m + 1, :] * a                                  # (1,NN)*(T,NN)
        gate = term if gate is None else gate + term

    # 3) + identity, added once from the precomputed flattened eye.
    out_ref[...] = gate + eye_ref[...]


def phase_act_layer(x, _mean, _std, adj_mx, adj_phase, phase_movements):
    """x: (B, N, T, F) float; _mean/_std: (1, 1, F, 1); returns (B, T, N, N)."""
    B, N, T, F = x.shape
    P = F - 3                         # number of phase one-hot channels (8)
    M = phase_movements.shape[1]      # number of movements
    NN = N * N

    x = x.astype(jnp.float32)

    # Grid-invariant scalars -> SMEM (only the phase-channel stats are needed).
    mean_p = _mean.reshape(F).astype(jnp.float32)[3:]                 # (P,)
    std_p = _std.reshape(F).astype(jnp.float32)[3:]                   # (P,)
    pm_flat = phase_movements.astype(jnp.float32).reshape(P * M)      # (P*M,)

    # Layout plumbing (one-time XLA work, outside the kernel):
    #  * slice phase channels and transpose to (B, P, T, N): contiguous per-batch slab
    #  * tile the node axis N times so columns are i*N+j and every in-kernel op /
    #    the output store is lane-dense (N*N = 256 is a multiple of 128 here).
    #    For production N >= 128 skip the tiling and use a (T, N, N) output block.
    xpt = jnp.transpose(x[..., 3:], (0, 3, 2, 1))                     # (B, P, T, N)
    xpe = jnp.tile(xpt, (1, 1, 1, N))                                 # (B, P, T, N*N)

    # Movement-major, flattened edge/movement gating table:
    #   w_flat[m, i*N+j] = 1 iff edge (i, j) exists and requires movement m.
    w = ((adj_mx > 0.0)[None, :, :]
         & (adj_phase[None, :, :] == jnp.arange(M, dtype=adj_phase.dtype)[:, None, None]))
    w_flat = w.astype(jnp.float32).reshape(M, NN)                     # (M, N*N)
    eye_flat = jnp.eye(N, dtype=jnp.float32).reshape(1, NN)           # (1, N*N)

    kernel = functools.partial(_phase_act_kernel,
                               n_phase=P, n_move=M, t_len=T, nn=NN)

    out_flat = pl.pallas_call(
        kernel,
        out_shape=jax.ShapeDtypeStruct((B, T, NN), jnp.float32),
        grid_spec=pltpu.PrefetchScalarGridSpec(
            num_scalar_prefetch=0,
            grid=(B,),
            in_specs=[
                pl.BlockSpec(memory_space=pltpu.MemorySpace.SMEM),    # mean_p
                pl.BlockSpec(memory_space=pltpu.MemorySpace.SMEM),    # std_p
                pl.BlockSpec(memory_space=pltpu.MemorySpace.SMEM),    # pm_flat
                pl.BlockSpec((None, P, T, NN), lambda b: (b, 0, 0, 0)),
                pl.BlockSpec((M, NN), lambda b: (0, 0)),
                pl.BlockSpec((1, NN), lambda b: (0, 0)),
            ],
            out_specs=pl.BlockSpec((None, T, NN), lambda b: (b, 0, 0)),
        ),
        compiler_params=pltpu.CompilerParams(
            dimension_semantics=("parallel",)),
    )(mean_p, std_p, pm_flat, xpe, w_flat, eye_flat)

    # Free row-major un-flatten back to (B, T, N, N).
    return out_flat.reshape(B, T, N, N)


def _reference(x, _mean, _std, adj_mx, adj_phase, phase_movements):
    """Pure-JAX reference mirroring the reconstructed forward semantics."""
    B, N, T, F = x.shape
    M = phase_movements.shape[1]
    xr = jnp.transpose(x, (0, 1, 3, 2)) * _std + _mean          # (B, N, F, T)
    ph = xr[:, :, 3:, :]                                         # (B, N, 8, T)
    bits = (jnp.abs(ph - 1.0) < 1e-6).astype(jnp.float32)
    act = jnp.minimum(jnp.einsum('bnpt,pm->btnm', bits, phase_movements), 1.0)
    w = (adj_mx > 0).astype(jnp.float32)[:, :, None] * jax.nn.one_hot(
        adj_phase, M, dtype=jnp.float32)
    out = jnp.einsum('ijm,btjm->btij', w, act) + jnp.eye(N, dtype=jnp.float32)
    return out


if __name__ == "__main__":
    B, N, T, F = 2, 16, 8, 11      # (b, N, T, F) with F = 11 as in the module
    P, M = 8, 8                    # 8 signal phases, 8 movements (NT,NL,ST,SL,ET,EL,WT,WL)

    key = jax.random.PRNGKey(0)
    k_adj, k_phadj, k_phase, k_feat, k_mean, k_std = jax.random.split(key, 6)

    # Deterministic synthetic "parameters" of the layer (adjacency + phase tables).
    adj_mx = (jax.random.uniform(k_adj, (N, N)) < 0.3).astype(jnp.float32)
    adj_mx = adj_mx * (1.0 - jnp.eye(N, dtype=jnp.float32))
    adj_phase = jax.random.randint(k_phadj, (N, N), 0, M)
    # 8-phase -> movement table (rows: phases, cols: NT NL ST SL ET EL WT WL)
    phase_movements = jnp.array(
        [[1, 0, 1, 0, 0, 0, 0, 0],
         [0, 1, 0, 1, 0, 0, 0, 0],
         [0, 0, 0, 0, 1, 0, 1, 0],
         [0, 0, 0, 0, 0, 1, 0, 1],
         [1, 1, 0, 0, 0, 0, 0, 0],
         [0, 0, 1, 1, 0, 0, 0, 0],
         [0, 0, 0, 0, 1, 1, 0, 0],
         [0, 0, 0, 0, 0, 0, 1, 1]], dtype=jnp.float32)

    # Inputs: first 3 features are normalized traffic features; features 3: are
    # a phase one-hot (stored un-normalized, so mean=0 / std=1 for them).
    cur_phase = jax.random.randint(k_phase, (B, N, T), 0, P)
    onehot = jax.nn.one_hot(cur_phase, P, dtype=jnp.float32)            # (B,N,T,8)
    other = jax.random.normal(k_feat, (B, N, T, 3), dtype=jnp.float32)
    x = jnp.concatenate([other, onehot], axis=-1)                       # (B,N,T,11)

    _mean = jnp.concatenate(
        [jax.random.normal(k_mean, (3,)), jnp.zeros((P,))]).reshape(1, 1, F, 1)
    _std = jnp.concatenate(
        [jnp.abs(jax.random.normal(k_std, (3,))) + 0.5, jnp.ones((P,))]
    ).reshape(1, 1, F, 1)
    _mean = _mean.astype(jnp.float32)
    _std = _std.astype(jnp.float32)

    out = phase_act_layer(x, _mean, _std, adj_mx, adj_phase, phase_movements)
    out = jax.block_until_ready(out)

    ref = _reference(x, _mean, _std, adj_mx, adj_phase, phase_movements)
    np.testing.assert_allclose(np.asarray(out), np.asarray(ref), atol=1e-5, rtol=1e-5)

    print("KERNEL_OK")
</pallas_src>

<mosaic_0001>
module attributes {stable_mosaic.version = 11 : i64} {
  func.func @_phase_act_kernel(%arg0: i32, %arg1: memref<8xf32, #tpu.memory_space<smem>>, %arg2: memref<8xf32, #tpu.memory_space<smem>>, %arg3: memref<64xf32, #tpu.memory_space<smem>>, %arg4: memref<1x8x8x256xf32, #tpu.memory_space<vmem>>, %arg5: memref<8x256xf32, #tpu.memory_space<vmem>>, %arg6: memref<1x256xf32, #tpu.memory_space<vmem>>, %arg7: memref<1x8x256xf32, #tpu.memory_space<vmem>>) attributes {dimension_semantics = [#tpu.dimension_semantics<parallel>], iteration_bounds = array<i64: 2>, scalar_prefetch = 0 : i64, scratch_operands = 0 : i64, tpu.core_type = #tpu.core_type<tc>, window_params = [{transform_indices = @transform_0, window_bounds = array<i64: 8>}, {transform_indices = @transform_1, window_bounds = array<i64: 8>}, {transform_indices = @transform_2, window_bounds = array<i64: 64>}, {transform_indices = @transform_3, window_bounds = array<i64: 1, 8, 8, 256>}, {pipeline_mode = #tpu.pipeline_mode<synchronous>, transform_indices = @transform_4, window_bounds = array<i64: 8, 256>}, {pipeline_mode = #tpu.pipeline_mode<synchronous>, transform_indices = @transform_5, window_bounds = array<i64: 1, 256>}, {transform_indices = @transform_6, window_bounds = array<i64: 1, 8, 256>}]} {
    %c0 = arith.constant 0 : index
    %c0_0 = arith.constant 0 : index
    %c0_1 = arith.constant 0 : index
    %c0_2 = arith.constant 0 : index
    %0 = vector.load %arg4[%c0, %c0_0, %c0_1, %c0_2] : memref<1x8x8x256xf32, #tpu.memory_space<vmem>>, vector<1x1x8x256xf32>
    %1 = vector.shape_cast %0 : vector<1x1x8x256xf32> to vector<8x256xf32>
    %c0_3 = arith.constant 0 : index
    %2 = memref.load %arg2[%c0_3] : memref<8xf32, #tpu.memory_space<smem>>
    %3 = vector.broadcast %2 : f32 to vector<8x256xf32>
    %4 = arith.mulf %1, %3 : vector<8x256xf32>
    %c0_4 = arith.constant 0 : index
    %5 = memref.load %arg1[%c0_4] : memref<8xf32, #tpu.memory_space<smem>>
    %6 = vector.broadcast %5 : f32 to vector<8x256xf32>
    %7 = arith.addf %4, %6 : vector<8x256xf32>
    %cst = arith.constant 1.000000e+00 : f32
    %8 = vector.broadcast %cst : f32 to vector<8x256xf32>
    %9 = arith.subf %7, %8 : vector<8x256xf32>
    %10 = math.absf %9 : vector<8x256xf32>
    %cst_5 = arith.constant 9.99999997E-7 : f32
    %11 = vector.broadcast %cst_5 : f32 to vector<8x256xf32>
    %12 = arith.cmpf olt, %10, %11 : vector<8x256xf32>
    %13 = arith.extui %12 : vector<8x256xi1> to vector<8x256xi32>
    %14 = arith.sitofp %13 : vector<8x256xi32> to vector<8x256xf32>
    %c0_6 = arith.constant 0 : index
    %c1 = arith.constant 1 : index
    %c0_7 = arith.constant 0 : index
    %c0_8 = arith.constant 0 : index
    %15 = vector.load %arg4[%c0_6, %c1, %c0_7, %c0_8] : memref<1x8x8x256xf32, #tpu.memory_space<vmem>>, vector<1x1x8x256xf32>
    %16 = vector.shape_cast %15 : vector<1x1x8x256xf32> to vector<8x256xf32>
    %c1_9 = arith.constant 1 : index
    %17 = memref.load %arg2[%c1_9] : memref<8xf32, #tpu.memory_space<smem>>
    %18 = vector.broadcast %17 : f32 to vector<8x256xf32>
    %19 = arith.mulf %16, %18 : vector<8x256xf32>
    %c1_10 = arith.constant 1 : index
    %20 = memref.load %arg1[%c1_10] : memref<8xf32, #tpu.memory_space<smem>>
    %21 = vector.broadcast %20 : f32 to vector<8x256xf32>
    %22 = arith.addf %19, %21 : vector<8x256xf32>
    %cst_11 = arith.constant 1.000000e+00 : f32
    %23 = vector.broadcast %cst_11 : f32 to vector<8x256xf32>
    %24 = arith.subf %22, %23 : vector<8x256xf32>
    %25 = math.absf %24 : vector<8x256xf32>
    %cst_12 = arith.constant 9.99999997E-7 : f32
    %26 = vector.broadcast %cst_12 : f32 to vector<8x256xf32>
    %27 = arith.cmpf olt, %25, %26 : vector<8x256xf32>
    %28 = arith.extui %27 : vector<8x256xi1> to vector<8x256xi32>
    %29 = arith.sitofp %28 : vector<8x256xi32> to vector<8x256xf32>
    %c0_13 = arith.constant 0 : index
    %c2 = arith.constant 2 : index
    %c0_14 = arith.constant 0 : index
    %c0_15 = arith.constant 0 : index
    %30 = vector.load %arg4[%c0_13, %c2, %c0_14, %c0_15] : memref<1x8x8x256xf32, #tpu.memory_space<vmem>>, vector<1x1x8x256xf32>
    %31 = vector.shape_cast %30 : vector<1x1x8x256xf32> to vector<8x256xf32>
    %c2_16 = arith.constant 2 : index
    %32 = memref.load %arg2[%c2_16] : memref<8xf32, #tpu.memory_space<smem>>
    %33 = vector.broadcast %32 : f32 to vector<8x256xf32>
    %34 = arith.mulf %31, %33 : vector<8x256xf32>
    %c2_17 = arith.constant 2 : index
    %35 = memref.load %arg1[%c2_17] : memref<8xf32, #tpu.memory_space<smem>>
    %36 = vector.broadcast %35 : f32 to vector<8x256xf32>
    %37 = arith.addf %34, %36 : vector<8x256xf32>
    %cst_18 = arith.constant 1.000000e+00 : f32
    %38 = vector.broadcast %cst_18 : f32 to vector<8x256xf32>
    %39 = arith.subf %37, %38 : vector<8x256xf32>
    %40 = math.absf %39 : vector<8x256xf32>
    %cst_19 = arith.constant 9.99999997E-7 : f32
    %41 = vector.broadcast %cst_19 : f32 to vector<8x256xf32>
    %42 = arith.cmpf olt, %40, %41 : vector<8x256xf32>
    %43 = arith.extui %42 : vector<8x256xi1> to vector<8x256xi32>
    %44 = arith.sitofp %43 : vector<8x256xi32> to vector<8x256xf32>
    %c0_20 = arith.constant 0 : index
    %c3 = arith.constant 3 : index
    %c0_21 = arith.constant 0 : index
    %c0_22 = arith.constant 0 : index
    %45 = vector.load %arg4[%c0_20, %c3, %c0_21, %c0_22] : memref<1x8x8x256xf32, #tpu.memory_space<vmem>>, vector<1x1x8x256xf32>
    %46 = vector.shape_cast %45 : vector<1x1x8x256xf32> to vector<8x256xf32>
    %c3_23 = arith.constant 3 : index
    %47 = memref.load %arg2[%c3_23] : memref<8xf32, #tpu.memory_space<smem>>
    %48 = vector.broadcast %47 : f32 to vector<8x256xf32>
    %49 = arith.mulf %46, %48 : vector<8x256xf32>
    %c3_24 = arith.constant 3 : index
    %50 = memref.load %arg1[%c3_24] : memref<8xf32, #tpu.memory_space<smem>>
    %51 = vector.broadcast %50 : f32 to vector<8x256xf32>
    %52 = arith.addf %49, %51 : vector<8x256xf32>
    %cst_25 = arith.constant 1.000000e+00 : f32
    %53 = vector.broadcast %cst_25 : f32 to vector<8x256xf32>
    %54 = arith.subf %52, %53 : vector<8x256xf32>
    %55 = math.absf %54 : vector<8x256xf32>
    %cst_26 = arith.constant 9.99999997E-7 : f32
    %56 = vector.broadcast %cst_26 : f32 to vector<8x256xf32>
    %57 = arith.cmpf olt, %55, %56 : vector<8x256xf32>
    %58 = arith.extui %57 : vector<8x256xi1> to vector<8x256xi32>
    %59 = arith.sitofp %58 : vector<8x256xi32> to vector<8x256xf32>
    %c0_27 = arith.constant 0 : index
    %c4 = arith.constant 4 : index
    %c0_28 = arith.constant 0 : index
    %c0_29 = arith.constant 0 : index
    %60 = vector.load %arg4[%c0_27, %c4, %c0_28, %c0_29] : memref<1x8x8x256xf32, #tpu.memory_space<vmem>>, vector<1x1x8x256xf32>
    %61 = vector.shape_cast %60 : vector<1x1x8x256xf32> to vector<8x256xf32>
    %c4_30 = arith.constant 4 : index
    %62 = memref.load %arg2[%c4_30] : memref<8xf32, #tpu.memory_space<smem>>
    %63 = vector.broadcast %62 : f32 to vector<8x256xf32>
    %64 = arith.mulf %61, %63 : vector<8x256xf32>
    %c4_31 = arith.constant 4 : index
    %65 = memref.load %arg1[%c4_31] : memref<8xf32, #tpu.memory_space<smem>>
    %66 = vector.broadcast %65 : f32 to vector<8x256xf32>
    %67 = arith.addf %64, %66 : vector<8x256xf32>
    %cst_32 = arith.constant 1.000000e+00 : f32
    %68 = vector.broadcast %cst_32 : f32 to vector<8x256xf32>
    %69 = arith.subf %67, %68 : vector<8x256xf32>
    %70 = math.absf %69 : vector<8x256xf32>
    %cst_33 = arith.constant 9.99999997E-7 : f32
    %71 = vector.broadcast %cst_33 : f32 to vector<8x256xf32>
    %72 = arith.cmpf olt, %70, %71 : vector<8x256xf32>
    %73 = arith.extui %72 : vector<8x256xi1> to vector<8x256xi32>
    %74 = arith.sitofp %73 : vector<8x256xi32> to vector<8x256xf32>
    %c0_34 = arith.constant 0 : index
    %c5 = arith.constant 5 : index
    %c0_35 = arith.constant 0 : index
    %c0_36 = arith.constant 0 : index
    %75 = vector.load %arg4[%c0_34, %c5, %c0_35, %c0_36] : memref<1x8x8x256xf32, #tpu.memory_space<vmem>>, vector<1x1x8x256xf32>
    %76 = vector.shape_cast %75 : vector<1x1x8x256xf32> to vector<8x256xf32>
    %c5_37 = arith.constant 5 : index
    %77 = memref.load %arg2[%c5_37] : memref<8xf32, #tpu.memory_space<smem>>
    %78 = vector.broadcast %77 : f32 to vector<8x256xf32>
    %79 = arith.mulf %76, %78 : vector<8x256xf32>
    %c5_38 = arith.constant 5 : index
    %80 = memref.load %arg1[%c5_38] : memref<8xf32, #tpu.memory_space<smem>>
    %81 = vector.broadcast %80 : f32 to vector<8x256xf32>
    %82 = arith.addf %79, %81 : vector<8x256xf32>
    %cst_39 = arith.constant 1.000000e+00 : f32
    %83 = vector.broadcast %cst_39 : f32 to vector<8x256xf32>
    %84 = arith.subf %82, %83 : vector<8x256xf32>
    %85 = math.absf %84 : vector<8x256xf32>
    %cst_40 = arith.constant 9.99999997E-7 : f32
    %86 = vector.broadcast %cst_40 : f32 to vector<8x256xf32>
    %87 = arith.cmpf olt, %85, %86 : vector<8x256xf32>
    %88 = arith.extui %87 : vector<8x256xi1> to vector<8x256xi32>
    %89 = arith.sitofp %88 : vector<8x256xi32> to vector<8x256xf32>
    %c0_41 = arith.constant 0 : index
    %c6 = arith.constant 6 : index
    %c0_42 = arith.constant 0 : index
    %c0_43 = arith.constant 0 : index
    %90 = vector.load %arg4[%c0_41, %c6, %c0_42, %c0_43] : memref<1x8x8x256xf32, #tpu.memory_space<vmem>>, vector<1x1x8x256xf32>
    %91 = vector.shape_cast %90 : vector<1x1x8x256xf32> to vector<8x256xf32>
    %c6_44 = arith.constant 6 : index
    %92 = memref.load %arg2[%c6_44] : memref<8xf32, #tpu.memory_space<smem>>
    %93 = vector.broadcast %92 : f32 to vector<8x256xf32>
    %94 = arith.mulf %91, %93 : vector<8x256xf32>
    %c6_45 = arith.constant 6 : index
    %95 = memref.load %arg1[%c6_45] : memref<8xf32, #tpu.memory_space<smem>>
    %96 = vector.broadcast %95 : f32 to vector<8x256xf32>
    %97 = arith.addf %94, %96 : vector<8x256xf32>
    %cst_46 = arith.constant 1.000000e+00 : f32
    %98 = vector.broadcast %cst_46 : f32 to vector<8x256xf32>
    %99 = arith.subf %97, %98 : vector<8x256xf32>
    %100 = math.absf %99 : vector<8x256xf32>
    %cst_47 = arith.constant 9.99999997E-7 : f32
    %101 = vector.broadcast %cst_47 : f32 to vector<8x256xf32>
    %102 = arith.cmpf olt, %100, %101 : vector<8x256xf32>
    %103 = arith.extui %102 : vector<8x256xi1> to vector<8x256xi32>
    %104 = arith.sitofp %103 : vector<8x256xi32> to vector<8x256xf32>
    %c0_48 = arith.constant 0 : index
    %c7 = arith.constant 7 : index
    %c0_49 = arith.constant 0 : index
    %c0_50 = arith.constant 0 : index
    %105 = vector.load %arg4[%c0_48, %c7, %c0_49, %c0_50] : memref<1x8x8x256xf32, #tpu.memory_space<vmem>>, vector<1x1x8x256xf32>
    %106 = vector.shape_cast %105 : vector<1x1x8x256xf32> to vector<8x256xf32>
    %c7_51 = arith.constant 7 : index
    %107 = memref.load %arg2[%c7_51] : memref<8xf32, #tpu.memory_space<smem>>
    %108 = vector.broadcast %107 : f32 to vector<8x256xf32>
    %109 = arith.mulf %106, %108 : vector<8x256xf32>
    %c7_52 = arith.constant 7 : index
    %110 = memref.load %arg1[%c7_52] : memref<8xf32, #tpu.memory_space<smem>>
    %111 = vector.broadcast %110 : f32 to vector<8x256xf32>
    %112 = arith.addf %109, %111 : vector<8x256xf32>
    %cst_53 = arith.constant 1.000000e+00 : f32
    %113 = vector.broadcast %cst_53 : f32 to vector<8x256xf32>
    %114 = arith.subf %112, %113 : vector<8x256xf32>
    %115 = math.absf %114 : vector<8x256xf32>
    %cst_54 = arith.constant 9.99999997E-7 : f32
    %116 = vector.broadcast %cst_54 : f32 to vector<8x256xf32>
    %117 = arith.cmpf olt, %115, %116 : vector<8x256xf32>
    %118 = arith.extui %117 : vector<8x256xi1> to vector<8x256xi32>
    %119 = arith.sitofp %118 : vector<8x256xi32> to vector<8x256xf32>
    %c0_55 = arith.constant 0 : index
    %120 = memref.load %arg3[%c0_55] : memref<64xf32, #tpu.memory_space<smem>>
    %121 = vector.broadcast %120 : f32 to vector<8x256xf32>
    %122 = arith.mulf %14, %121 : vector<8x256xf32>
    %c8 = arith.constant 8 : index
    %123 = memref.load %arg3[%c8] : memref<64xf32, #tpu.memory_space<smem>>
    %124 = vector.broadcast %123 : f32 to vector<8x256xf32>
    %125 = arith.mulf %29, %124 : vector<8x256xf32>
    %126 = arith.addf %122, %125 : vector<8x256xf32>
    %c16 = arith.constant 16 : index
    %127 = memref.load %arg3[%c16] : memref<64xf32, #tpu.memory_space<smem>>
    %128 = vector.broadcast %127 : f32 to vector<8x256xf32>
    %129 = arith.mulf %44, %128 : vector<8x256xf32>
    %130 = arith.addf %126, %129 : vector<8x256xf32>
    %c24 = arith.constant 24 : index
    %131 = memref.load %arg3[%c24] : memref<64xf32, #tpu.memory_space<smem>>
    %132 = vector.broadcast %131 : f32 to vector<8x256xf32>
    %133 = arith.mulf %59, %132 : vector<8x256xf32>
    %134 = arith.addf %130, %133 : vector<8x256xf32>
    %c32 = arith.constant 32 : index
    %135 = memref.load %arg3[%c32] : memref<64xf32, #tpu.memory_space<smem>>
    %136 = vector.broadcast %135 : f32 to vector<8x256xf32>
    %137 = arith.mulf %74, %136 : vector<8x256xf32>
    %138 = arith.addf %134, %137 : vector<8x256xf32>
    %c40 = arith.constant 40 : index
    %139 = memref.load %arg3[%c40] : memref<64xf32, #tpu.memory_space<smem>>
    %140 = vector.broadcast %139 : f32 to vector<8x256xf32>
    %141 = arith.mulf %89, %140 : vector<8x256xf32>
    %142 = arith.addf %138, %141 : vector<8x256xf32>
    %c48 = arith.constant 48 : index
    %143 = memref.load %arg3[%c48] : memref<64xf32, #tpu.memory_space<smem>>
    %144 = vector.broadcast %143 : f32 to vector<8x256xf32>
    %145 = arith.mulf %104, %144 : vector<8x256xf32>
    %146 = arith.addf %142, %145 : vector<8x256xf32>
    %c56 = arith.constant 56 : index
    %147 = memref.load %arg3[%c56] : memref<64xf32, #tpu.memory_space<smem>>
    %148 = vector.broadcast %147 : f32 to vector<8x256xf32>
    %149 = arith.mulf %119, %148 : vector<8x256xf32>
    %150 = arith.addf %146, %149 : vector<8x256xf32>
    %cst_56 = arith.constant 1.000000e+00 : f32
    %151 = vector.broadcast %cst_56 : f32 to vector<8x256xf32>
    %152 = arith.minimumf %150, %151 : vector<8x256xf32>
    %c0_57 = arith.constant 0 : index
    %c0_58 = arith.constant 0 : index
    %153 = vector.load %arg5[%c0_57, %c0_58] : memref<8x256xf32, #tpu.memory_space<vmem>>, vector<1x256xf32>
    %154 = vector.broadcast %153 : vector<1x256xf32> to vector<8x256xf32>
    %155 = arith.mulf %154, %152 : vector<8x256xf32>
    %c1_59 = arith.constant 1 : index
    %156 = memref.load %arg3[%c1_59] : memref<64xf32, #tpu.memory_space<smem>>
    %157 = vector.broadcast %156 : f32 to vector<8x256xf32>
    %158 = arith.mulf %14, %157 : vector<8x256xf32>
    %c9 = arith.constant 9 : index
    %159 = memref.load %arg3[%c9] : memref<64xf32, #tpu.memory_space<smem>>
    %160 = vector.broadcast %159 : f32 to vector<8x256xf32>
    %161 = arith.mulf %29, %160 : vector<8x256xf32>
    %162 = arith.addf %158, %161 : vector<8x256xf32>
    %c17 = arith.constant 17 : index
    %163 = memref.load %arg3[%c17] : memref<64xf32, #tpu.memory_space<smem>>
    %164 = vector.broadcast %163 : f32 to vector<8x256xf32>
    %165 = arith.mulf %44, %164 : vector<8x256xf32>
    %166 = arith.addf %162, %165 : vector<8x256xf32>
    %c25 = arith.constant 25 : index
    %167 = memref.load %arg3[%c25] : memref<64xf32, #tpu.memory_space<smem>>
    %168 = vector.broadcast %167 : f32 to vector<8x256xf32>
    %169 = arith.mulf %59, %168 : vector<8x256xf32>
    %170 = arith.addf %166, %169 : vector<8x256xf32>
    %c33 = arith.constant 33 : index
    %171 = memref.load %arg3[%c33] : memref<64xf32, #tpu.memory_space<smem>>
    %172 = vector.broadcast %171 : f32 to vector<8x256xf32>
    %173 = arith.mulf %74, %172 : vector<8x256xf32>
    %174 = arith.addf %170, %173 : vector<8x256xf32>
    %c41 = arith.constant 41 : index
    %175 = memref.load %arg3[%c41] : memref<64xf32, #tpu.memory_space<smem>>
    %176 = vector.broadcast %175 : f32 to vector<8x256xf32>
    %177 = arith.mulf %89, %176 : vector<8x256xf32>
    %178 = arith.addf %174, %177 : vector<8x256xf32>
    %c49 = arith.constant 49 : index
    %179 = memref.load %arg3[%c49] : memref<64xf32, #tpu.memory_space<smem>>
    %180 = vector.broadcast %179 : f32 to vector<8x256xf32>
    %181 = arith.mulf %104, %180 : vector<8x256xf32>
    %182 = arith.addf %178, %181 : vector<8x256xf32>
    %c57 = arith.constant 57 : index
    %183 = memref.load %arg3[%c57] : memref<64xf32, #tpu.memory_space<smem>>
    %184 = vector.broadcast %183 : f32 to vector<8x256xf32>
    %185 = arith.mulf %119, %184 : vector<8x256xf32>
    %186 = arith.addf %182, %185 : vector<8x256xf32>
    %cst_60 = arith.constant 1.000000e+00 : f32
    %187 = vector.broadcast %cst_60 : f32 to vector<8x256xf32>
    %188 = arith.minimumf %186, %187 : vector<8x256xf32>
    %c1_61 = arith.constant 1 : index
    %c0_62 = arith.constant 0 : index
    %189 = vector.load %arg5[%c1_61, %c0_62] : memref<8x256xf32, #tpu.memory_space<vmem>>, vector<1x256xf32>
    %190 = vector.broadcast %189 : vector<1x256xf32> to vector<8x256xf32>
    %191 = arith.mulf %190, %188 : vector<8x256xf32>
    %192 = arith.addf %155, %191 : vector<8x256xf32>
    %c2_63 = arith.constant 2 : index
    %193 = memref.load %arg3[%c2_63] : memref<64xf32, #tpu.memory_space<smem>>
    %194 = vector.broadcast %193 : f32 to vector<8x256xf32>
    %195 = arith.mulf %14, %194 : vector<8x256xf32>
    %c10 = arith.constant 10 : index
    %196 = memref.load %arg3[%c10] : memref<64xf32, #tpu.memory_space<smem>>
    %197 = vector.broadcast %196 : f32 to vector<8x256xf32>
    %198 = arith.mulf %29, %197 : vector<8x256xf32>
    %199 = arith.addf %195, %198 : vector<8x256xf32>
    %c18 = arith.constant 18 : index
    %200 = memref.load %arg3[%c18] : memref<64xf32, #tpu.memory_space<smem>>
    %201 = vector.broadcast %200 : f32 to vector<8x256xf32>
    %202 = arith.mulf %44, %201 : vector<8x256xf32>
    %203 = arith.addf %199, %202 : vector<8x256xf32>
    %c26 = arith.constant 26 : index
    %204 = memref.load %arg3[%c26] : memref<64xf32, #tpu.memory_space<smem>>
    %205 = vector.broadcast %204 : f32 to vector<8x256xf32>
    %206 = arith.mulf %59, %205 : vector<8x256xf32>
    %207 = arith.addf %203, %206 : vector<8x256xf32>
    %c34 = arith.constant 34 : index
    %208 = memref.load %arg3[%c34] : memref<64xf32, #tpu.memory_space<smem>>
    %209 = vector.broadcast %208 : f32 to vector<8x256xf32>
    %210 = arith.mulf %74, %209 : vector<8x256xf32>
    %211 = arith.addf %207, %210 : vector<8x256xf32>
    %c42 = arith.constant 42 : index
    %212 = memref.load %arg3[%c42] : memref<64xf32, #tpu.memory_space<smem>>
    %213 = vector.broadcast %212 : f32 to vector<8x256xf32>
    %214 = arith.mulf %89, %213 : vector<8x256xf32>
    %215 = arith.addf %211, %214 : vector<8x256xf32>
    %c50 = arith.constant 50 : index
    %216 = memref.load %arg3[%c50] : memref<64xf32, #tpu.memory_space<smem>>
    %217 = vector.broadcast %216 : f32 to vector<8x256xf32>
    %218 = arith.mulf %104, %217 : vector<8x256xf32>
    %219 = arith.addf %215, %218 : vector<8x256xf32>
    %c58 = arith.constant 58 : index
    %220 = memref.load %arg3[%c58] : memref<64xf32, #tpu.memory_space<smem>>
    %221 = vector.broadcast %220 : f32 to vector<8x256xf32>
    %222 = arith.mulf %119, %221 : vector<8x256xf32>
    %223 = arith.addf %219, %222 : vector<8x256xf32>
    %cst_64 = arith.constant 1.000000e+00 : f32
    %224 = vector.broadcast %cst_64 : f32 to vector<8x256xf32>
    %225 = arith.minimumf %223, %224 : vector<8x256xf32>
    %c2_65 = arith.constant 2 : index
    %c0_66 = arith.constant 0 : index
    %226 = vector.load %arg5[%c2_65, %c0_66] : memref<8x256xf32, #tpu.memory_space<vmem>>, vector<1x256xf32>
    %227 = vector.broadcast %226 : vector<1x256xf32> to vector<8x256xf32>
    %228 = arith.mulf %227, %225 : vector<8x256xf32>
    %229 = arith.addf %192, %228 : vector<8x256xf32>
    %c3_67 = arith.constant 3 : index
    %230 = memref.load %arg3[%c3_67] : memref<64xf32, #tpu.memory_space<smem>>
    %231 = vector.broadcast %230 : f32 to vector<8x256xf32>
    %232 = arith.mulf %14, %231 : vector<8x256xf32>
    %c11 = arith.constant 11 : index
    %233 = memref.load %arg3[%c11] : memref<64xf32, #tpu.memory_space<smem>>
    %234 = vector.broadcast %233 : f32 to vector<8x256xf32>
    %235 = arith.mulf %29, %234 : vector<8x256xf32>
    %236 = arith.addf %232, %235 : vector<8x256xf32>
    %c19 = arith.constant 19 : index
    %237 = memref.load %arg3[%c19] : memref<64xf32, #tpu.memory_space<smem>>
    %238 = vector.broadcast %237 : f32 to vector<8x256xf32>
    %239 = arith.mulf %44, %238 : vector<8x256xf32>
    %240 = arith.addf %236, %239 : vector<8x256xf32>
    %c27 = arith.constant 27 : index
    %241 = memref.load %arg3[%c27] : memref<64xf32, #tpu.memory_space<smem>>
    %242 = vector.broadcast %241 : f32 to vector<8x256xf32>
    %243 = arith.mulf %59, %242 : vector<8x256xf32>
    %244 = arith.addf %240, %243 : vector<8x256xf32>
    %c35 = arith.constant 35 : index
    %245 = memref.load %arg3[%c35] : memref<64xf32, #tpu.memory_space<smem>>
    %246 = vector.broadcast %245 : f32 to vector<8x256xf32>
    %247 = arith.mulf %74, %246 : vector<8x256xf32>
    %248 = arith.addf %244, %247 : vector<8x256xf32>
    %c43 = arith.constant 43 : index
    %249 = memref.load %arg3[%c43] : memref<64xf32, #tpu.memory_space<smem>>
    %250 = vector.broadcast %249 : f32 to vector<8x256xf32>
    %251 = arith.mulf %89, %250 : vector<8x256xf32>
    %252 = arith.addf %248, %251 : vector<8x256xf32>
    %c51 = arith.constant 51 : index
    %253 = memref.load %arg3[%c51] : memref<64xf32, #tpu.memory_space<smem>>
    %254 = vector.broadcast %253 : f32 to vector<8x256xf32>
    %255 = arith.mulf %104, %254 : vector<8x256xf32>
    %256 = arith.addf %252, %255 : vector<8x256xf32>
    %c59 = arith.constant 59 : index
    %257 = memref.load %arg3[%c59] : memref<64xf32, #tpu.memory_space<smem>>
    %258 = vector.broadcast %257 : f32 to vector<8x256xf32>
    %259 = arith.mulf %119, %258 : vector<8x256xf32>
    %260 = arith.addf %256, %259 : vector<8x256xf32>
    %cst_68 = arith.constant 1.000000e+00 : f32
    %261 = vector.broadcast %cst_68 : f32 to vector<8x256xf32>
    %262 = arith.minimumf %260, %261 : vector<8x256xf32>
    %c3_69 = arith.constant 3 : index
    %c0_70 = arith.constant 0 : index
    %263 = vector.load %arg5[%c3_69, %c0_70] : memref<8x256xf32, #tpu.memory_space<vmem>>, vector<1x256xf32>
    %264 = vector.broadcast %263 : vector<1x256xf32> to vector<8x256xf32>
    %265 = arith.mulf %264, %262 : vector<8x256xf32>
    %266 = arith.addf %229, %265 : vector<8x256xf32>
    %c4_71 = arith.constant 4 : index
    %267 = memref.load %arg3[%c4_71] : memref<64xf32, #tpu.memory_space<smem>>
    %268 = vector.broadcast %267 : f32 to vector<8x256xf32>
    %269 = arith.mulf %14, %268 : vector<8x256xf32>
    %c12 = arith.constant 12 : index
    %270 = memref.load %arg3[%c12] : memref<64xf32, #tpu.memory_space<smem>>
    %271 = vector.broadcast %270 : f32 to vector<8x256xf32>
    %272 = arith.mulf %29, %271 : vector<8x256xf32>
    %273 = arith.addf %269, %272 : vector<8x256xf32>
    %c20 = arith.constant 20 : index
    %274 = memref.load %arg3[%c20] : memref<64xf32, #tpu.memory_space<smem>>
    %275 = vector.broadcast %274 : f32 to vector<8x256xf32>
    %276 = arith.mulf %44, %275 : vector<8x256xf32>
    %277 = arith.addf %273, %276 : vector<8x256xf32>
    %c28 = arith.constant 28 : index
    %278 = memref.load %arg3[%c28] : memref<64xf32, #tpu.memory_space<smem>>
    %279 = vector.broadcast %278 : f32 to vector<8x256xf32>
    %280 = arith.mulf %59, %279 : vector<8x256xf32>
    %281 = arith.addf %277, %280 : vector<8x256xf32>
    %c36 = arith.constant 36 : index
    %282 = memref.load %arg3[%c36] : memref<64xf32, #tpu.memory_space<smem>>
    %283 = vector.broadcast %282 : f32 to vector<8x256xf32>
    %284 = arith.mulf %74, %283 : vector<8x256xf32>
    %285 = arith.addf %281, %284 : vector<8x256xf32>
    %c44 = arith.constant 44 : index
    %286 = memref.load %arg3[%c44] : memref<64xf32, #tpu.memory_space<smem>>
    %287 = vector.broadcast %286 : f32 to vector<8x256xf32>
    %288 = arith.mulf %89, %287 : vector<8x256xf32>
    %289 = arith.addf %285, %288 : vector<8x256xf32>
    %c52 = arith.constant 52 : index
    %290 = memref.load %arg3[%c52] : memref<64xf32, #tpu.memory_space<smem>>
    %291 = vector.broadcast %290 : f32 to vector<8x256xf32>
    %292 = arith.mulf %104, %291 : vector<8x256xf32>
    %293 = arith.addf %289, %292 : vector<8x256xf32>
    %c60 = arith.constant 60 : index
    %294 = memref.load %arg3[%c60] : memref<64xf32, #tpu.memory_space<smem>>
    %295 = vector.broadcast %294 : f32 to vector<8x256xf32>
    %296 = arith.mulf %119, %295 : vector<8x256xf32>
    %297 = arith.addf %293, %296 : vector<8x256xf32>
    %cst_72 = arith.constant 1.000000e+00 : f32
    %298 = vector.broadcast %cst_72 : f32 to vector<8x256xf32>
    %299 = arith.minimumf %297, %298 : vector<8x256xf32>
    %c4_73 = arith.constant 4 : index
    %c0_74 = arith.constant 0 : index
    %300 = vector.load %arg5[%c4_73, %c0_74] : memref<8x256xf32, #tpu.memory_space<vmem>>, vector<1x256xf32>
    %301 = vector.broadcast %300 : vector<1x256xf32> to vector<8x256xf32>
    %302 = arith.mulf %301, %299 : vector<8x256xf32>
    %303 = arith.addf %266, %302 : vector<8x256xf32>
    %c5_75 = arith.constant 5 : index
    %304 = memref.load %arg3[%c5_75] : memref<64xf32, #tpu.memory_space<smem>>
    %305 = vector.broadcast %304 : f32 to vector<8x256xf32>
    %306 = arith.mulf %14, %305 : vector<8x256xf32>
    %c13 = arith.constant 13 : index
    %307 = memref.load %arg3[%c13] : memref<64xf32, #tpu.memory_space<smem>>
    %308 = vector.broadcast %307 : f32 to vector<8x256xf32>
    %309 = arith.mulf %29, %308 : vector<8x256xf32>
    %310 = arith.addf %306, %309 : vector<8x256xf32>
    %c21 = arith.constant 21 : index
    %311 = memref.load %arg3[%c21] : memref<64xf32, #tpu.memory_space<smem>>
    %312 = vector.broadcast %311 : f32 to vector<8x256xf32>
    %313 = arith.mulf %44, %312 : vector<8x256xf32>
    %314 = arith.addf %310, %313 : vector<8x256xf32>
    %c29 = arith.constant 29 : index
    %315 = memref.load %arg3[%c29] : memref<64xf32, #tpu.memory_space<smem>>
    %316 = vector.broadcast %315 : f32 to vector<8x256xf32>
    %317 = arith.mulf %59, %316 : vector<8x256xf32>
    %318 = arith.addf %314, %317 : vector<8x256xf32>
    %c37 = arith.constant 37 : index
    %319 = memref.load %arg3[%c37] : memref<64xf32, #tpu.memory_space<smem>>
    %320 = vector.broadcast %319 : f32 to vector<8x256xf32>
    %321 = arith.mulf %74, %320 : vector<8x256xf32>
    %322 = arith.addf %318, %321 : vector<8x256xf32>
    %c45 = arith.constant 45 : index
    %323 = memref.load %arg3[%c45] : memref<64xf32, #tpu.memory_space<smem>>
    %324 = vector.broadcast %323 : f32 to vector<8x256xf32>
    %325 = arith.mulf %89, %324 : vector<8x256xf32>
    %326 = arith.addf %322, %325 : vector<8x256xf32>
    %c53 = arith.constant 53 : index
    %327 = memref.load %arg3[%c53] : memref<64xf32, #tpu.memory_space<smem>>
    %328 = vector.broadcast %327 : f32 to vector<8x256xf32>
    %329 = arith.mulf %104, %328 : vector<8x256xf32>
    %330 = arith.addf %326, %329 : vector<8x256xf32>
    %c61 = arith.constant 61 : index
    %331 = memref.load %arg3[%c61] : memref<64xf32, #tpu.memory_space<smem>>
    %332 = vector.broadcast %331 : f32 to vector<8x256xf32>
    %333 = arith.mulf %119, %332 : vector<8x256xf32>
    %334 = arith.addf %330, %333 : vector<8x256xf32>
    %cst_76 = arith.constant 1.000000e+00 : f32
    %335 = vector.broadcast %cst_76 : f32 to vector<8x256xf32>
    %336 = arith.minimumf %334, %335 : vector<8x256xf32>
    %c5_77 = arith.constant 5 : index
    %c0_78 = arith.constant 0 : index
    %337 = vector.load %arg5[%c5_77, %c0_78] : memref<8x256xf32, #tpu.memory_space<vmem>>, vector<1x256xf32>
    %338 = vector.broadcast %337 : vector<1x256xf32> to vector<8x256xf32>
    %339 = arith.mulf %338, %336 : vector<8x256xf32>
    %340 = arith.addf %303, %339 : vector<8x256xf32>
    %c6_79 = arith.constant 6 : index
    %341 = memref.load %arg3[%c6_79] : memref<64xf32, #tpu.memory_space<smem>>
    %342 = vector.broadcast %341 : f32 to vector<8x256xf32>
    %343 = arith.mulf %14, %342 : vector<8x256xf32>
    %c14 = arith.constant 14 : index
    %344 = memref.load %arg3[%c14] : memref<64xf32, #tpu.memory_space<smem>>
    %345 = vector.broadcast %344 : f32 to vector<8x256xf32>
    %346 = arith.mulf %29, %345 : vector<8x256xf32>
    %347 = arith.addf %343, %346 : vector<8x256xf32>
    %c22 = arith.constant 22 : index
    %348 = memref.load %arg3[%c22] : memref<64xf32, #tpu.memory_space<smem>>
    %349 = vector.broadcast %348 : f32 to vector<8x256xf32>
    %350 = arith.mulf %44, %349 : vector<8x256xf32>
    %351 = arith.addf %347, %350 : vector<8x256xf32>
    %c30 = arith.constant 30 : index
    %352 = memref.load %arg3[%c30] : memref<64xf32, #tpu.memory_space<smem>>
    %353 = vector.broadcast %352 : f32 to vector<8x256xf32>
    %354 = arith.mulf %59, %353 : vector<8x256xf32>
    %355 = arith.addf %351, %354 : vector<8x256xf32>
    %c38 = arith.constant 38 : index
    %356 = memref.load %arg3[%c38] : memref<64xf32, #tpu.memory_space<smem>>
    %357 = vector.broadcast %356 : f32 to vector<8x256xf32>
    %358 = arith.mulf %74, %357 : vector<8x256xf32>
    %359 = arith.addf %355, %358 : vector<8x256xf32>
    %c46 = arith.constant 46 : index
    %360 = memref.load %arg3[%c46] : memref<64xf32, #tpu.memory_space<smem>>
    %361 = vector.broadcast %360 : f32 to vector<8x256xf32>
    %362 = arith.mulf %89, %361 : vector<8x256xf32>
    %363 = arith.addf %359, %362 : vector<8x256xf32>
    %c54 = arith.constant 54 : index
    %364 = memref.load %arg3[%c54] : memref<64xf32, #tpu.memory_space<smem>>
    %365 = vector.broadcast %364 : f32 to vector<8x256xf32>
    %366 = arith.mulf %104, %365 : vector<8x256xf32>
    %367 = arith.addf %363, %366 : vector<8x256xf32>
    %c62 = arith.constant 62 : index
    %368 = memref.load %arg3[%c62] : memref<64xf32, #tpu.memory_space<smem>>
    %369 = vector.broadcast %368 : f32 to vector<8x256xf32>
    %370 = arith.mulf %119, %369 : vector<8x256xf32>
    %371 = arith.addf %367, %370 : vector<8x256xf32>
    %cst_80 = arith.constant 1.000000e+00 : f32
    %372 = vector.broadcast %cst_80 : f32 to vector<8x256xf32>
    %373 = arith.minimumf %371, %372 : vector<8x256xf32>
    %c6_81 = arith.constant 6 : index
    %c0_82 = arith.constant 0 : index
    %374 = vector.load %arg5[%c6_81, %c0_82] : memref<8x256xf32, #tpu.memory_space<vmem>>, vector<1x256xf32>
    %375 = vector.broadcast %374 : vector<1x256xf32> to vector<8x256xf32>
    %376 = arith.mulf %375, %373 : vector<8x256xf32>
    %377 = arith.addf %340, %376 : vector<8x256xf32>
    %c7_83 = arith.constant 7 : index
    %378 = memref.load %arg3[%c7_83] : memref<64xf32, #tpu.memory_space<smem>>
    %379 = vector.broadcast %378 : f32 to vector<8x256xf32>
    %380 = arith.mulf %14, %379 : vector<8x256xf32>
    %c15 = arith.constant 15 : index
    %381 = memref.load %arg3[%c15] : memref<64xf32, #tpu.memory_space<smem>>
    %382 = vector.broadcast %381 : f32 to vector<8x256xf32>
    %383 = arith.mulf %29, %382 : vector<8x256xf32>
    %384 = arith.addf %380, %383 : vector<8x256xf32>
    %c23 = arith.constant 23 : index
    %385 = memref.load %arg3[%c23] : memref<64xf32, #tpu.memory_space<smem>>
    %386 = vector.broadcast %385 : f32 to vector<8x256xf32>
    %387 = arith.mulf %44, %386 : vector<8x256xf32>
    %388 = arith.addf %384, %387 : vector<8x256xf32>
    %c31 = arith.constant 31 : index
    %389 = memref.load %arg3[%c31] : memref<64xf32, #tpu.memory_space<smem>>
    %390 = vector.broadcast %389 : f32 to vector<8x256xf32>
    %391 = arith.mulf %59, %390 : vector<8x256xf32>
    %392 = arith.addf %388, %391 : vector<8x256xf32>
    %c39 = arith.constant 39 : index
    %393 = memref.load %arg3[%c39] : memref<64xf32, #tpu.memory_space<smem>>
    %394 = vector.broadcast %393 : f32 to vector<8x256xf32>
    %395 = arith.mulf %74, %394 : vector<8x256xf32>
    %396 = arith.addf %392, %395 : vector<8x256xf32>
    %c47 = arith.constant 47 : index
    %397 = memref.load %arg3[%c47] : memref<64xf32, #tpu.memory_space<smem>>
    %398 = vector.broadcast %397 : f32 to vector<8x256xf32>
    %399 = arith.mulf %89, %398 : vector<8x256xf32>
    %400 = arith.addf %396, %399 : vector<8x256xf32>
    %c55 = arith.constant 55 : index
    %401 = memref.load %arg3[%c55] : memref<64xf32, #tpu.memory_space<smem>>
    %402 = vector.broadcast %401 : f32 to vector<8x256xf32>
    %403 = arith.mulf %104, %402 : vector<8x256xf32>
    %404 = arith.addf %400, %403 : vector<8x256xf32>
    %c63 = arith.constant 63 : index
    %405 = memref.load %arg3[%c63] : memref<64xf32, #tpu.memory_space<smem>>
    %406 = vector.broadcast %405 : f32 to vector<8x256xf32>
    %407 = arith.mulf %119, %406 : vector<8x256xf32>
    %408 = arith.addf %404, %407 : vector<8x256xf32>
    %cst_84 = arith.constant 1.000000e+00 : f32
    %409 = vector.broadcast %cst_84 : f32 to vector<8x256xf32>
    %410 = arith.minimumf %408, %409 : vector<8x256xf32>
    %c7_85 = arith.constant 7 : index
    %c0_86 = arith.constant 0 : index
    %411 = vector.load %arg5[%c7_85, %c0_86] : memref<8x256xf32, #tpu.memory_space<vmem>>, vector<1x256xf32>
    %412 = vector.broadcast %411 : vector<1x256xf32> to vector<8x256xf32>
    %413 = arith.mulf %412, %410 : vector<8x256xf32>
    %414 = arith.addf %377, %413 : vector<8x256xf32>
    %c0_87 = arith.constant 0 : index
    %c0_88 = arith.constant 0 : index
    %415 = vector.load %arg6[%c0_87, %c0_88] : memref<1x256xf32, #tpu.memory_space<vmem>>, vector<1x256xf32>
    %416 = vector.broadcast %415 : vector<1x256xf32> to vector<8x256xf32>
    %417 = arith.addf %414, %416 : vector<8x256xf32>
    %c0_89 = arith.constant 0 : index
    %c0_90 = arith.constant 0 : index
    %c0_91 = arith.constant 0 : index
    %418 = vector.load %arg7[%c0_89, %c0_90, %c0_91] : memref<1x8x256xf32, #tpu.memory_space<vmem>>, vector<1x8x256xf32>
    %419 = vector.shape_cast %418 : vector<1x8x256xf32> to vector<8x256xf32>
    %420 = vector.shape_cast %417 : vector<8x256xf32> to vector<1x8x256xf32>
    tpu.vector_store %arg7[%c0_89, %c0_90, %c0_91], %420 {strides = array<i32>} : memref<1x8x256xf32, #tpu.memory_space<vmem>>, vector<1x8x256xf32>,
    return
  }
  func.func @transform_0(%arg0: i32) -> i32 {
    %c0_i32 = arith.constant 0 : i32
    %c0_i32_0 = arith.constant 0 : i32
    return %c0_i32 : i32
  }
  func.func @transform_1(%arg0: i32) -> i32 {
    %c0_i32 = arith.constant 0 : i32
    %c0_i32_0 = arith.constant 0 : i32
    return %c0_i32 : i32
  }
  func.func @transform_2(%arg0: i32) -> i32 {
    %c0_i32 = arith.constant 0 : i32
    %c0_i32_0 = arith.constant 0 : i32
    return %c0_i32 : i32
  }
  func.func @transform_3(%arg0: i32) -> (i32, i32, i32, i32) {
    %c0_i32 = arith.constant 0 : i32
    %c0_i32_0 = arith.constant 0 : i32
    %c0_i32_1 = arith.constant 0 : i32
    %c0_i32_2 = arith.constant 0 : i32
    return %arg0, %c0_i32, %c0_i32_0, %c0_i32_1 : i32, i32, i32, i32
  }
  func.func @transform_4(%arg0: i32) -> (i32, i32) {
    %c0_i32 = arith.constant 0 : i32
    %c0_i32_0 = arith.constant 0 : i32
    %c0_i32_1 = arith.constant 0 : i32
    return %c0_i32, %c0_i32_0 : i32, i32
  }
  func.func @transform_5(%arg0: i32) -> (i32, i32) {
    %c0_i32 = arith.constant 0 : i32
    %c0_i32_0 = arith.constant 0 : i32
    %c0_i32_1 = arith.constant 0 : i32
    return %c0_i32, %c0_i32_0 : i32, i32
  }
  func.func @transform_6(%arg0: i32) -> (i32, i32, i32) {
    %c0_i32 = arith.constant 0 : i32
    %c0_i32_0 = arith.constant 0 : i32
    %c0_i32_1 = arith.constant 0 : i32
    return %arg0, %c0_i32, %c0_i32_0 : i32, i32, i32
  }
}

</mosaic_0001>

<bundles_post_ra>
// kernel: tpu_custom_call.1
= control target key start
LH: loop header
LB: loop body
LE: loop exit
PB: predicated region body
PF: predicated region fallthrough
CT: control target
= control target key end

     0   :  { %11 = vsyncpa [#allocation5], 0  ;;  %s2344_s0 = inlined_call_operand.hbm [shape: f32[8], index: 0, kind: input, shape index: {}]   ;;  %s2345_s1 = inlined_call_operand.vmem [shape: f32[8], index: 1, kind: input, shape index: {}]   ;;  %s2346_s2 = inlined_call_operand.vmem [shape: f32[64], index: 2, kind: input, shape index: {}]   ;;  %s2347_s3 = inlined_call_operand.hbm [shape: f32[2,8,8,256], index: 3, kind: input, shape index: {}]   ;;  %s2348_s4 = inlined_call_operand.hbm [shape: f32[8,256], index: 4, kind: input, shape index: {}]   ;;  %s2349_s5 = inlined_call_operand.vmem [shape: f32[1,256], index: 5, kind: input, shape index: {}]   ;;  %s2350_s6 = inlined_call_operand.hbm [shape: f32[2,8,256], index: 6, kind: output, shape index: {}]  }
   0x1   :  { %12 = vsyncpa [#allocation6], 0 }
   0x2   :  { %13 = vsyncpa [#allocation9], 0 }
   0x3   :  { %14 = vsyncpa [#allocation3], 0 }
   0x4   :  { %16 = vsyncpa [#allocation3 + $0x1], 0 }
   0x5   :  { %17 = vsyncpa [#allocation12], 0 }
   0x6   :  { %18 = vsyncpa [#allocation4], 0 }
   0x7   :  { %20 = vsyncpa [#allocation4 + $0x1], 0  ;;  %s1616_s21 = smov 0   ;;  %s1618_s22 = smov 0  }
   0x8   :  { %s1620_s23 = smov 0   ;;  %s1622_s24 = smov 0  }
   0x9 LB: > { %s1637_s25 = sadd.s32 4294967295, %s1570_s24   ;;  %s1150_s26 = sadd.s32 4294967294, %s1570_s24   ;;  %s1570_s24 = sphi %s1622_s24, %s2377_s24   ;;  %s1566_s23 = sphi %s1620_s23, %s2376_s23   ;;  %s1562_s22 = sphi %s1618_s22, %s2375_s22   ;;  %s1558_s21 = sphi %s1616_s21, %s2374_s21  }
   0xa   : > { %p109_p0 = scmp.ne.s32.totalorder %s1562_s22, %s1558_s21  ;;  %p2351_p1 = scmp.eq.s32.totalorder %s1637_s25, 0 }
   0xb   : > { %p181_p3 = scmp.eq.s32.totalorder %s1150_s26, 1  ;;  %p1151_p5 = scmp.ge.s32.totalorder %s1570_s24, 1 }
   0xc   : > { %p1646_p4 = por %p2351_p1, %p109_p0  ;;  %p188_p7 = scmp.lt.s32.totalorder %s1570_s24, 3 }
   0xd   : > { %p1651_p6 = por %p181_p3, %p109_p0  ;;  %s210_s8 = sshll.u32 %s2345_s1, 4  ;;  %s211_s8 = int_to_ptr.vmem [resolvable:$true] %s210_s8 }
   0xe   : > { %s2354_s27 = scalar_select %p1646_p4, 1, 0 }
   0xf   : > { %s2355_s28 = scalar_select %p1651_p6, 1, 0 }
  0x10   : > { %p1656_p8 = pnand %p1151_p5, %p188_p7  ;;  %s221_s11 = sshll.u32 %s2346_s2, 4  ;;  %s1675_s11 = int_to_ptr.vmem [resolvable:$true] %s221_s11 }
  0x11   : > { %s1572_s13 = smov [#allocation11]   ;;  %s1387_s17 = scalar_lea.hbm %s2344_s0, 16 }
  0x12   : > { %s2356_s29 = scalar_select %p1656_p8, 1, 0 }
  0x13   : > { %p1317_p10 = pneg %p1656_p8  ;;  %s1677_s14 = sshll.u32 %s1572_s13, 4  ;;  %s233_s14 = int_to_ptr.vmem [resolvable:$true] %s1677_s14 }
  0x14   : > { %p1388_p12 = scmp.ne.s32.totalorder %s2344_s0, %s1387_s17  ;;  %p1394_p5 = scmp.lt.u32.totalorder %s1387_s17, %s2344_s0 }
  0x15   : > { %p1671_p11 = pnand %p1317_p10, %p2351_p1 }
  0x17   : > { %p1687_p13 = pneg %p1671_p11 }
  0x19   : > { %p1390_p0 = pnand %p1687_p13, %p1388_p12 }
  0x1b   : > { %p1391_p3 = pneg %p1390_p0 }
  0x1d   : > { %p1396_p7 = pnand %p1394_p5, %p1391_p3 }
  0x1f   : > { %1399 = shalt.err (!%p1396_p7)
}
  0x20   : > { %s1573_s7 = smov [#allocation2]   ;;  %s1400_s13 = scalar_lea.vmem %s211_s8, 16 }
  0x21   : > { %1320 = dma.hbm_to_smem (!%p1671_p11), %s2344_s0, 16, %s1573_s7, [#allocation5]  }
  0x22   : > { %p1401_p10 = scmp.ne.s32.totalorder %s211_s8, %s1400_s13  ;;  %p1408_p0 = scmp.lt.s32.totalorder %s211_s8, %s211_s8 }
  0x23   : > { %p1409_p1 = scmp.lt.s32.totalorder %s1400_s13, %s1400_s13 }
  0x24   : > { %p1403_p9 = pnand %p1401_p10, %p1687_p13 }
  0x25   : > { %p1410_p2 = por %p1409_p1, %p1408_p0 }
  0x26   : > { %p1404_p12 = pneg %p1403_p9 }
  0x28   : > { %p1411_p6 = pnand %p1410_p2, %p1404_p12 }
  0x2a   : > { %1414 = shalt.err (!%p1411_p6)
}
  0x2b   : > { %s1574_s15 = smov [#allocation7]   ;;  %s1415_s16 = scalar_lea.vmem %s1675_s11, 16 }
  0x2c   : > { %1323 = dma.vmem_to_smem (!%p1671_p11), %s211_s8, 16, %s1574_s15, [#allocation6]  }
  0x2d   : > { %p1416_p3 = scmp.ne.s32.totalorder %s1675_s11, %s1415_s16  ;;  %p1423_p9 = scmp.lt.s32.totalorder %s1675_s11, %s1675_s11 }
  0x2e   : > { %p1424_p10 = scmp.lt.s32.totalorder %s1415_s16, %s1415_s16 }
  0x2f   : > { %p1418_p5 = pnand %p1416_p3, %p1687_p13 }
  0x30   : > { %p1425_p4 = por %p1424_p10, %p1423_p9 }
  0x31   : > { %p1419_p7 = pneg %p1418_p5 }
  0x33   : > { %p1426_p1 = pnand %p1425_p4, %p1419_p7 }
  0x35   : > { %1429 = shalt.err (!%p1426_p1)
}
  0x36   : > { %s1575_s17 = smov [#allocation8]   ;;  %s1430_s19 = scalar_lea.hbm %s2348_s4, 256 }
  0x37   : > { %1326 = dma.vmem_to_smem (!%p1671_p11), %s1675_s11, 16, %s1575_s17, [#allocation9]  }
  0x38   : > { %p1431_p2 = scmp.ne.s32.totalorder %s2348_s4, %s1430_s19  ;;  %p1437_p12 = scmp.lt.u32.totalorder %s1430_s19, %s2348_s4 }
  0x3a   : > { %p1433_p6 = pnand %p1431_p2, %p1687_p13 }
  0x3c   : > { %p1434_p4 = pneg %p1433_p6 }
  0x3e   : > { %p1439_p0 = pnand %p1437_p12, %p1434_p4 }
  0x40   : > { %1442 = shalt.err (!%p1439_p0)
}
  0x41   : > { %s1443_s10 = scalar_lea.vmem %s233_s14, 256  ;;  %p1451_p9 = scmp.lt.s32.totalorder %s233_s14, %s233_s14 }
  0x42   : > { %p1444_p3 = scmp.ne.s32.totalorder %s233_s14, %s1443_s10  ;;  %p1452_p10 = scmp.lt.s32.totalorder %s1443_s10, %s1443_s10 }
  0x44   : > { %p1446_p5 = pnand %p1444_p3, %p1687_p13  ;;  %p1453_p1 = por %p1452_p10, %p1451_p9 }
  0x46   : > { %p1447_p7 = pneg %p1446_p5 }
  0x48   : > { %p1454_p8 = pnand %p1453_p1, %p1447_p7 }
  0x4a   : > { %1457 = shalt.err (!%p1454_p8)
}
  0x4b   : > { %1329 = dma.hbm_to_vmem [thread:$0]  (!%p1671_p11), %s2348_s4, 256, %s233_s14, [#allocation12]  }
  0x4c   : > { %s1734_s20 = sadd.s32 1, %s1570_s24   ;;  %s96_s15 = sadd.s32 1, %s1566_s23 }
  0x4d   : > { %s93_s12 = ssub.s32 %s1570_s24, %s1734_s20  ;;  %p103_p8 = scmp.ne.s32.totalorder %s1566_s23, %s1562_s22 }
  0x4e   : > { %p94_p13 = scmp.eq.s32.totalorder %s93_s12, 0  ;;  %p104_p2 = scmp.eq.s32.totalorder %s1570_s24, 0 }
  0x4f   : > { %p2359_p6 = scmp.eq.s32.totalorder %s1637_s25, 1  ;;  %p1342_p12 = scmp.lt.s32.totalorder %s1570_s24, 2 }
  0x50   : > { %s1750_s17 = scalar_select %p94_p13, %s1566_s23, %s96_s15  }
  0x51   : > { %p1744_p4 = por %p2359_p6, %p103_p8  ;;  %p105_p0 = por %p104_p2, %p103_p8 }
  0x52   : > { %s246_s8 = sand.u32 1, %s1566_s23   ;;  %s1295_s14 = sshll.u32 %s1570_s24, 11 }
  0x53   : > { %s1157_s18 = sshll.u32 %s246_s8, 7  ;;  %s1757_s30 = scalar_lea.hbm %s2347_s3, %s1295_s14 }
  0x54   : > { %s250_s7 = scalar_lea.vmem [#allocation10], %s1157_s18  ;;  %p1761_p11 = pnand %p1342_p12, %p105_p0 }
  0x55   : > { %s257_s9 = sshll.u32 %s250_s7, 4  ;;  %s1765_s11 = scalar_lea.sflag [#allocation3], %s246_s8  ;;  %s1759_s9 = int_to_ptr.vmem [resolvable:$true] %s257_s9 }
  0x56   : > { %s1458_s13 = scalar_lea.hbm %s1757_s30, 2048  ;;  %p1460_p5 = pneg %p1761_p11 }
  0x57   : > { %p1459_p3 = scmp.ne.s32.totalorder %s1757_s30, %s1458_s13  ;;  %s1463_s18 = scalar_lea.hbm %s2347_s3, 4096 }
  0x58   : > { %p1464_p10 = scmp.lt.u32.totalorder %s1757_s30, %s2347_s3  ;;  %p1465_p1 = scmp.lt.u32.totalorder %s1463_s18, %s1458_s13 }
  0x59   : > { %p1461_p7 = pnand %p1460_p5, %p1459_p3  ;;  %p1467_p13 = scmp.lt.u32.totalorder %s1458_s13, %s1757_s30 }
  0x5a   : > { %p1466_p8 = por %p1465_p1, %p1464_p10 }
  0x5b   : > { %p1462_p9 = pneg %p1461_p7 }
  0x5c   : > { %p1468_p2 = por %p1467_p13, %p1466_p8 }
  0x5e   : > { %p1469_p6 = pnand %p1468_p2, %p1462_p9 }
  0x60   : > { %1472 = shalt.err (!%p1469_p6)
}
  0x61   : > { %s1473_s8 = scalar_lea.vmem %s1759_s9, 2048  ;;  %s1576_s26 = smov [#allocation10]  }
  0x62   : > { %p1474_p12 = scmp.ne.s32.totalorder %s1759_s9, %s1473_s8  ;;  %s1478_s7 = sshll.u32 %s1576_s26, 4  ;;  %s1479_s7 = int_to_ptr.vmem [resolvable:$false] %s1478_s7 }
  0x63   : > { %s1480_s15 = scalar_lea.vmem %s1479_s7, 4096  ;;  %p1481_p7 = scmp.lt.s32.totalorder %s1759_s9, %s1479_s7 }
  0x64   : > { %p1476_p0 = pnand %p1474_p12, %p1460_p5  ;;  %p1482_p10 = scmp.lt.s32.totalorder %s1480_s15, %s1473_s8 }
  0x66   : > { %p1477_p3 = pneg %p1476_p0  ;;  %p1483_p1 = por %p1482_p10, %p1481_p7 }
  0x68   : > { %p1484_p8 = pnand %p1483_p1, %p1477_p3 }
  0x6a   : > { %1487 = shalt.err (!%p1484_p8)
}
  0x6b   : > { %s1577_s13 = smov 256   ;;  %s1578_s12 = smov 16  }
  0x6c   : > { %1333 = dma.hbm_to_vmem [thread:$0]  (!%p1761_p11), %s1757_s30, 2048, %s1759_s9, %s1765_s11, %s1577_s13, %s1577_s13, %s1578_s12  }
  0x6d   : > { %p2362_p5 = scmp.ne.s32.totalorder %s2356_s29, 0 }
  0x6e   : > { %p2363_p9 = scmp.eq.s32.totalorder (!%p2362_p5), %s1637_s25, 0 }
  0x6f   : > { %269 = sbr.rel (%p2362_p5) target bundleno = 284 (0x11c), region = 44 }
  0x76   : > { %1533 = dma.done.wait (%p2363_p9), [#allocation5], 16   ;;  %p2364_p13 = pmov %p2363_p9 }
  0x77   : > { %p2365_p2 = pmov %p2363_p9 }
  0x78   : > { %1535 = vsyncadd (%p2364_p13), [#allocation5], 4294967280 }
  0x79   : > { %1537 = dma.done.wait (%p2365_p2), [#allocation6], 16   ;;  %p2366_p6 = pmov %p2365_p2 }
  0x7a   : > { %p2367_p12 = pmov %p2365_p2 }
  0x7b   : > { %1539 = vsyncadd (%p2366_p6), [#allocation6], 4294967280 }
  0x7c   : > { %1541 = dma.done.wait (%p2367_p12), [#allocation9], 16   ;;  %p2368_p11 = pmov %p2365_p2 }
  0x7d   : > { %s1808_s29 = sand.u32 1, %s1562_s22   ;;  %p2369_p0 = scmp.ne.s32.totalorder %s2354_s27, 0 }
  0x7e   : > { %1543 = vsyncadd (%p2368_p11), [#allocation9], 4294967280  ;;  %s1164_s30 = sshll.u32 %s1808_s29, 7  ;;  %s284_s9 = scalar_lea.sflag [#allocation3], %s1808_s29 }
  0x7f   : > { %s1812_s10 = scalar_lea.vmem [#allocation10], %s1164_s30 }
  0x80   : > { %1545 = dma.done.wait (%p2369_p0), %s284_s9, 2048  }
  0x81   : > { %1547 = vsyncadd (%p2369_p0), %s284_s9, 4294965248  ;;  %p2370_p3 = pmov %p2365_p2 }
  0x82   : > { %p2371_p7 = pmov %p2365_p2 }
  0x83   : > { %1549 = dma.done.wait (%p2370_p3), [#allocation12], 256  }
  0x84   : > { %1551 = vsyncadd (%p2371_p7), [#allocation12], 4294967040 }
  0x85   : > { %296 = sfence }
  0x86   : > { %s323_s11 = sld [smem:[#allocation7]]  ;;  %s1173_s14 = sld [smem:[#allocation7 + $0x1]]  ;;  %v321_v0 = vld [vmem:[%s1812_s10] sm:$0xff]  ;;  %v322_v1 = vld [vmem:[%s1812_s10 + $0x8] sm:$0xff]  ;;  %v538_v2 = vlaneseq  ;;  %v1171_v4 = vld [vmem:[%s1812_s10 + $0x10] sm:$0xff]  ;;  %v1579_v43 = vmov 0.0  }
  0x87   : > { %s327_s18 = sld [smem:[#allocation2]]  ;;  %s1822_s19 = sld [smem:[#allocation2 + $0x1]]  ;;  %v1172_v5 = vld [vmem:[%s1812_s10 + $0x18] sm:$0xff]  ;;  %v1179_v11 = vld [vmem:[%s1812_s10 + $0x20] sm:$0xff]  ;;  %v1180_v17 = vld [vmem:[%s1812_s10 + $0x28] sm:$0xff] }
  0x88   : > { %s1824_s8 = sld [smem:[#allocation7 + $0x2]]  ;;  %s1830_s26 = sld [smem:[#allocation7 + $0x3]]  ;;  %v1840_v12 = vshrl.u32 %v538_v2, 7  ;;  %v1187_v18 = vld [vmem:[%s1812_s10 + $0x30] sm:$0xff]  ;;  %v1188_v19 = vld [vmem:[%s1812_s10 + $0x38] sm:$0xff]  ;;  %v1195_v40 = vld [vmem:[%s1812_s10 + $0x40] sm:$0xff] }
  0x89   : > { %s1826_s27 = sld [smem:[#allocation2 + $0x2]]  ;;  %s1832_s7 = sld [smem:[#allocation2 + $0x3]]  ;;  %v1196_v48 = vld [vmem:[%s1812_s10 + $0x48] sm:$0xff]  ;;  %v1203_v61 = vld [vmem:[%s1812_s10 + $0x50] sm:$0xff]  ;;  %v1204_v62 = vld [vmem:[%s1812_s10 + $0x58] sm:$0xff] }
  0x8a   : > { %s1836_s15 = sld [smem:[#allocation7 + $0x4]]  ;;  %s1851_s12 = sld [smem:[#allocation7 + $0x5]]  ;;  %v1211_v2 = vld [vmem:[%s1812_s10 + $0x60] sm:$0xff] }
  0x8b   : > { %s1849_s13 = sld [smem:[#allocation2 + $0x4]]  ;;  %s1853_s30 = sld [smem:[#allocation2 + $0x5]] }
  0x8c   : > { %v324_v3 = vstv %s323_s11  ;;  %v345_v9 = vstv %s1173_s14  ;;  %s1855_s9 = sld [smem:[#allocation7 + $0x6]]  ;;  %s1862_s14 = sld [smem:[#allocation2 + $0x7]] }
  0x8d   : > { %v325_v6 = vmul.f32 %v324_v3, %v321_v0  ;;  %v326_v7 = vmul.f32 %v324_v3, %v322_v1  ;;  %v328_v8 = vstv %s327_s18  ;;  %v349_v10 = vstv %s1822_s19  ;;  %s1857_s11 = sld [smem:[#allocation2 + $0x6]]  ;;  %s1860_s18 = sld [smem:[#allocation7 + $0x7]] }
  0x8e   : > { %v346_v15 = vmul.f32 %v1171_v4, %v345_v9  ;;  %v347_v16 = vmul.f32 %v1172_v5, %v345_v9  ;;  %v366_v20 = vstv %s1824_s8  ;;  %v387_v22 = vstv %s1830_s26  ;;  %s1892_s19 = sld [smem:[#allocation8]] }
  0x8f   : > { %v329_v13 = vadd.f32 %v328_v8, %v325_v6  ;;  %v330_v14 = vadd.f32 %v328_v8, %v326_v7  ;;  %v370_v21 = vstv %s1826_s27  ;;  %v391_v23 = vstv %s1832_s7  ;;  %s1902_s8 = sld [smem:[#allocation8 + $0x8]] }
  0x90   : > { %v350_v26 = vadd.f32 %v349_v10, %v346_v15  ;;  %v351_v27 = vadd.f32 %v349_v10, %v347_v16  ;;  %v367_v28 = vmul.f32 %v1179_v11, %v366_v20  ;;  %v368_v29 = vmul.f32 %v1180_v17, %v366_v20  ;;  %v1212_v10 = vld [vmem:[%s1812_s10 + $0x68] sm:$0xff]  ;;  %v1219_v20 = vld [vmem:[%s1812_s10 + $0x70] sm:$0xff]  ;;  %s1907_s27 = sld [smem:[#allocation8 + $0x10]] }
  0x91   : > { %v1167_v24 = vadd.f32 -1.0, %v329_v13  ;;  %v1168_v25 = vadd.f32 -1.0, %v330_v14  ;;  %v388_v30 = vmul.f32 %v1187_v18, %v387_v22  ;;  %v389_v31 = vmul.f32 %v1188_v19, %v387_v22  ;;  %s1909_s26 = sld [smem:[#allocation8 + $0x18]] }
  0x92   : > { %v1175_v34 = vadd.f32 -1.0, %v350_v26  ;;  %v1176_v35 = vadd.f32 -1.0, %v351_v27  ;;  %v371_v36 = vadd.f32 %v370_v21, %v367_v28  ;;  %v372_v37 = vadd.f32 %v370_v21, %v368_v29  ;;  %s1914_s7 = sld [smem:[#allocation8 + $0x20]] }
  0x93   : > { %v333_v32 = vand.u32 2147483647, %v1167_v24  ;;  %v334_v33 = vand.u32 2147483647, %v1168_v25  ;;  %v392_v38 = vadd.f32 %v391_v23, %v388_v30  ;;  %v393_v39 = vadd.f32 %v391_v23, %v389_v31  ;;  %v1220_v23 = vld [vmem:[%s1812_s10 + $0x78] sm:$0xff]  ;;  %s1920_s10 = sld [smem:[#allocation8 + $0x28]] }
  0x94   : > { %v354_v41 = vand.u32 2147483647, %v1175_v34  ;;  %v408_v42 = vstv %s1836_s15  ;;  %v355_v46 = vand.u32 2147483647, %v1176_v35  ;;  %v1183_v47 = vadd.f32 -1.0, %v371_v36  ;;  %s1929_s15 = sld [smem:[#allocation8 + $0x30]] }
  0x95   : > { %vm335_vm0 = vcmp.lt.f32.partialorder %v333_v32, 1e-06  ;;  %vm336_vm1 = vcmp.lt.f32.partialorder %v334_v33, 1e-06  ;;  %v1184_v49 = vadd.f32 -1.0, %v372_v37  ;;  %v1191_v50 = vadd.f32 -1.0, %v392_v38 }
  0x96   : > { %v1866_v44 = vsel %vm335_vm0, 1.0, %v1579_v43  ;;  %v1869_v45 = vsel %vm336_vm1, 1.0, %v1579_v43  ;;  %vm356_vm2 = vcmp.lt.f32.partialorder %v354_v41, 1e-06  ;;  %v1192_v51 = vadd.f32 -1.0, %v393_v39 }
  0x97   : > { %vm357_vm3 = vcmp.lt.f32.partialorder %v355_v46, 1e-06  ;;  %v1873_v52 = vsel %vm356_vm2, 1.0, %v1579_v43  ;;  %v375_v53 = vand.u32 2147483647, %v1183_v47  ;;  %v409_v54 = vmul.f32 %v1195_v40, %v408_v42 }
  0x98   : > { %v1876_v55 = vsel %vm357_vm3, 1.0, %v1579_v43  ;;  %v376_v56 = vand.u32 2147483647, %v1184_v49  ;;  %v396_v57 = vand.u32 2147483647, %v1191_v50  ;;  %v410_v58 = vmul.f32 %v1196_v48, %v408_v42 }
  0x99   : > { %vm377_vm4 = vcmp.lt.f32.partialorder %v375_v53, 1e-06  ;;  %v397_v59 = vand.u32 2147483647, %v1192_v51  ;;  %v412_v60 = vstv %s1849_s13  ;;  %v429_v63 = vstv %s1851_s12  ;;  %s1937_s13 = sld [smem:[#allocation8 + $0x38]]  ;;  %s1946_s12 = sld [smem:[#allocation8 + $0x1]] }
  0x9a   : > { %vm378_vm5 = vcmp.lt.f32.partialorder %v376_v56, 1e-06  ;;  %v1883_v0 = vsel %vm377_vm4, 1.0, %v1579_v43  ;;  %vm398_vm6 = vcmp.lt.f32.partialorder %v396_v57, 1e-06  ;;  %v413_v1 = vadd.f32 %v412_v60, %v409_v54 }
  0x9b   : > { %v1887_v3 = vsel %vm378_vm5, 1.0, %v1579_v43  ;;  %vm399_vm7 = vcmp.lt.f32.partialorder %v397_v59, 1e-06  ;;  %v1890_v4 = vsel %vm398_vm6, 1.0, %v1579_v43  ;;  %v414_v5 = vadd.f32 %v412_v60, %v410_v58 }
  0x9c   : > { %v1895_v6 = vsel %vm399_vm7, 1.0, %v1579_v43  ;;  %v1199_v7 = vadd.f32 -1.0, %v413_v1  ;;  %v430_v8 = vmul.f32 %v1203_v61, %v429_v63  ;;  %v431_v9 = vmul.f32 %v1204_v62, %v429_v63 }
  0x9d   : > { %v1200_v11 = vadd.f32 -1.0, %v414_v5  ;;  %v433_v13 = vstv %s1853_s30  ;;  %v450_v14 = vstv %s1855_s9  ;;  %v454_v15 = vstv %s1857_s11  ;;  %s1948_s30 = sld [smem:[#allocation8 + $0x9]] }
  0x9e   : > { %v417_v16 = vand.u32 2147483647, %v1199_v7  ;;  %v434_v17 = vadd.f32 %v433_v13, %v430_v8  ;;  %v435_v18 = vadd.f32 %v433_v13, %v431_v9  ;;  %v451_v19 = vmul.f32 %v1211_v2, %v450_v14  ;;  %s1956_s9 = sld [smem:[#allocation8 + $0x11]] }
  0x9f   : > { %v418_v21 = vand.u32 2147483647, %v1200_v11  ;;  %v452_v22 = vmul.f32 %v1212_v10, %v450_v14  ;;  %v471_v24 = vstv %s1860_s18  ;;  %v475_v25 = vstv %s1862_s14  ;;  %s1963_s11 = sld [smem:[#allocation8 + $0x19]] }
  0xa0   : > { %vm419_vm8 = vcmp.lt.f32.partialorder %v417_v16, 1e-06  ;;  %v1207_v26 = vadd.f32 -1.0, %v434_v17  ;;  %v1208_v27 = vadd.f32 -1.0, %v435_v18  ;;  %v455_v28 = vadd.f32 %v454_v15, %v451_v19  ;;  %s1970_s18 = sld [smem:[#allocation8 + $0x21]] }
  0xa1   : > { %vm420_vm9 = vcmp.lt.f32.partialorder %v418_v21, 1e-06  ;;  %v1912_v29 = vsel %vm419_vm8, 1.0, %v1579_v43  ;;  %v456_v30 = vadd.f32 %v454_v15, %v452_v22  ;;  %v472_v31 = vmul.f32 %v1219_v20, %v471_v24  ;;  %s1972_s14 = sld [smem:[#allocation8 + $0x29]] }
  0xa2   : > { %v1917_v32 = vsel %vm420_vm9, 1.0, %v1579_v43  ;;  %v438_v33 = vand.u32 2147483647, %v1207_v26  ;;  %v439_v34 = vand.u32 2147483647, %v1208_v27  ;;  %v1215_v35 = vadd.f32 -1.0, %v455_v28 }
  0xa3   : > { %v1216_v36 = vadd.f32 -1.0, %v456_v30  ;;  %v473_v37 = vmul.f32 %v1220_v23, %v471_v24  ;;  %v476_v38 = vadd.f32 %v475_v25, %v472_v31  ;;  %v489_v39 = vstv %s1892_s19  ;;  %s1989_s19 = sld [smem:[#allocation8 + $0x31]] }
  0xa4   : > { %vm440_vm10 = vcmp.lt.f32.partialorder %v438_v33, 1e-06  ;;  %vm441_vm11 = vcmp.lt.f32.partialorder %v439_v34, 1e-06  ;;  %v459_v40 = vand.u32 2147483647, %v1215_v35  ;;  %v490_v41 = vmul.f32 %v1866_v44, %v489_v39 }
  0xa5   : > { %v1924_v42 = vsel %vm440_vm10, 1.0, %v1579_v43  ;;  %v1927_v46 = vsel %vm441_vm11, 1.0, %v1579_v43  ;;  %v460_v47 = vand.u32 2147483647, %v1216_v36  ;;  %v477_v48 = vadd.f32 %v475_v25, %v473_v37 }
  0xa6   : > { %vm461_vm12 = vcmp.lt.f32.partialorder %v459_v40, 1e-06  ;;  %v1223_v49 = vadd.f32 -1.0, %v476_v38  ;;  %v491_v50 = vmul.f32 %v1869_v45, %v489_v39  ;;  %v493_v51 = vstv %s1902_s8  ;;  %v1976_v25 = vld [vmem:[#allocation11] ss:$8 sm:$0x3] }
  0xa7   : > { %vm462_vm13 = vcmp.lt.f32.partialorder %v460_v47, 1e-06  ;;  %v1934_v53 = vsel %vm461_vm12, 1.0, %v1579_v43  ;;  %v1224_v54 = vadd.f32 -1.0, %v477_v48  ;;  %v494_v56 = vmul.f32 %v1873_v52, %v493_v51  ;;  %s1995_s8 = sld [smem:[#allocation8 + $0x39]] }
  0xa8   : > { %v1940_v57 = vsel %vm462_vm13, 1.0, %v1579_v43  ;;  %v480_v58 = vand.u32 2147483647, %v1223_v49  ;;  %v495_v59 = vmul.f32 %v1876_v55, %v493_v51  ;;  %v499_v60 = vstv %s1907_s27  ;;  %s2003_s27 = sld [smem:[#allocation8 + $0x2]] }
  0xa9   : > { %v481_v61 = vand.u32 2147483647, %v1224_v54  ;;  %v496_v62 = vadd.f32 %v494_v56, %v490_v41  ;;  %v500_v63 = vmul.f32 %v1883_v0, %v499_v60  ;;  %v501_v1 = vmul.f32 %v1887_v3, %v499_v60 }
  0xaa   : > { %vm482_vm14 = vcmp.lt.f32.partialorder %v480_v58, 1e-06  ;;  %v497_v2 = vadd.f32 %v495_v59, %v491_v50  ;;  %v505_v5 = vstv %s1909_s26  ;;  %v511_v7 = vstv %s1914_s7  ;;  %s2005_s26 = sld [smem:[#allocation8 + $0xa]] }
  0xab   : > { %vm483_vm15 = vcmp.lt.f32.partialorder %v481_v61, 1e-06  ;;  %v1953_v8 = vsel %vm482_vm14, 1.0, %v1579_v43  ;;  %v502_v9 = vadd.f32 %v500_v63, %v496_v62  ;;  %v506_v10 = vmul.f32 %v1890_v4, %v505_v5  ;;  %s2013_s7 = sld [smem:[#allocation8 + $0x12]] }
  0xac   : > { %v1959_v11 = vsel %vm483_vm15, 1.0, %v1579_v43  ;;  %v503_v13 = vadd.f32 %v501_v1, %v497_v2  ;;  %v507_v14 = vmul.f32 %v1895_v6, %v505_v5  ;;  %v512_v15 = vmul.f32 %v1912_v29, %v511_v7 }
  0xad   : > { %v508_v16 = vadd.f32 %v506_v10, %v502_v9  ;;  %v513_v17 = vmul.f32 %v1917_v32, %v511_v7  ;;  %v517_v18 = vstv %s1920_s10  ;;  %v523_v19 = vstv %s1929_s15  ;;  %s2015_s10 = sld [smem:[#allocation8 + $0x1a]] }
  0xae   : > { %v509_v20 = vadd.f32 %v507_v14, %v503_v13  ;;  %v518_v21 = vmul.f32 %v1924_v42, %v517_v18  ;;  %v519_v43 = vmul.f32 %v1927_v46, %v517_v18  ;;  %v524_v23 = vmul.f32 %v1934_v53, %v523_v19  ;;  %s2025_s15 = sld [smem:[#allocation8 + $0x22]] }
  0xaf   : > { %v514_v22 = vadd.f32 %v512_v15, %v508_v16  ;;  %v529_v24 = vstv %s1937_s13  ;;  %v1979_v26 = vsub.s32 0, %v1840_v12  ;;  %v525_v28 = vmul.f32 %v1940_v57, %v523_v19  ;;  %v599_v16 = vld [vmem:[#allocation11 + $0x1] ss:$8 sm:$0x3]  ;;  %s2027_s13 = sld [smem:[#allocation8 + $0x2a]] }
  0xb0   : > { %v515_v27 = vadd.f32 %v513_v17, %v509_v20  ;;  %v530_v30 = vmul.f32 %v1953_v8, %v529_v24  ;;  %v531_v31 = vmul.f32 %v1959_v11, %v529_v24  ;;  %v1985_v34 = vsub.s32 1, %v1840_v12 }
  0xb1   : > { %v520_v33 = vadd.f32 %v518_v21, %v514_v22  ;;  %v551_v35 = vstv %s1946_s12  ;;  %v555_v36 = vstv %s1948_s30  ;;  %v541_v38 = vrot.slane %v1976_v25, %v1979_v26  ;;  %s2038_s12 = sld [smem:[#allocation8 + $0x32]] }
  0xb2   : > { %v521_v37 = vadd.f32 %v519_v43, %v515_v27  ;;  %v552_v39 = vmul.f32 %v1866_v44, %v551_v35  ;;  %v553_v40 = vmul.f32 %v1869_v45, %v551_v35  ;;  %v556_v12 = vmul.f32 %v1873_v52, %v555_v36  ;;  %s2040_s30 = sld [smem:[#allocation8 + $0x3a]] }
  0xb3   : > { %v526_v41 = vadd.f32 %v524_v23, %v520_v33  ;;  %v557_v47 = vmul.f32 %v1876_v55, %v555_v36  ;;  %v561_v48 = vstv %s1956_s9  ;;  %v567_v54 = vstv %s1963_s11  ;;  %s2052_s9 = sld [smem:[#allocation8 + $0x3]] }
  0xb4   : > { %v527_v49 = vadd.f32 %v525_v28, %v521_v37  ;;  %v562_v50 = vmul.f32 %v1883_v0, %v561_v48  ;;  %v563_v51 = vmul.f32 %v1887_v3, %v561_v48  ;;  %v558_v58 = vadd.f32 %v556_v12, %v552_v39  ;;  %s2054_s11 = sld [smem:[#allocation8 + $0xb]] }
  0xb5   : > { %v532_v56 = vadd.f32 %v530_v30, %v526_v41  ;;  %v559_v59 = vadd.f32 %v557_v47, %v553_v40  ;;  %v568_v60 = vmul.f32 %v1890_v4, %v567_v54  ;;  %v569_v62 = vmul.f32 %v1895_v6, %v567_v54 }
  0xb6   : > { %v2008_v61 = vadd.f32 %v531_v31, %v527_v49  ;;  %v573_v63 = vstv %s1970_s18  ;;  %v579_v1 = vstv %s1972_s14  ;;  %v564_v5 = vadd.f32 %v562_v50, %v558_v58  ;;  %s2060_s18 = sld [smem:[#allocation8 + $0x13]] }
  0xb7   : > { %v534_v2 = vmin.f32 %v532_v56, 1.0  ;;  %v565_v7 = vadd.f32 %v563_v51, %v559_v59  ;;  %v574_v9 = vmul.f32 %v1912_v29, %v573_v63  ;;  %v545_v13 = vrot.slane %v1976_v25, %v1985_v34  ;;  %s2062_s14 = sld [smem:[#allocation8 + $0x1b]] }
  0xb8   : > { %v535_v10 = vmin.f32 %v2008_v61, 1.0  ;;  %v575_v14 = vmul.f32 %v1917_v32, %v573_v63  ;;  %v580_v15 = vmul.f32 %v1924_v42, %v579_v1  ;;  %v570_v17 = vadd.f32 %v568_v60, %v564_v5 }
  0xb9   : > { %v571_v18 = vadd.f32 %v569_v62, %v565_v7  ;;  %v581_v19 = vmul.f32 %v1927_v46, %v579_v1  ;;  %v585_v20 = vstv %s1989_s19  ;;  %v548_v21 = vmul.f32 %v541_v38, %v534_v2  ;;  %s2071_s19 = sld [smem:[#allocation8 + $0x23]] }
  0xba   : > { %v586_v43 = vmul.f32 %v1934_v53, %v585_v20  ;;  %v587_v22 = vmul.f32 %v1940_v57, %v585_v20  ;;  %v591_v23 = vstv %s1995_s8  ;;  %v576_v24 = vadd.f32 %v574_v9, %v570_v17  ;;  %s2073_s8 = sld [smem:[#allocation8 + $0x2b]] }
  0xbb   : > { %v577_v25 = vadd.f32 %v575_v14, %v571_v18  ;;  %v592_v27 = vmul.f32 %v1953_v8, %v591_v23  ;;  %v593_v28 = vmul.f32 %v1959_v11, %v591_v23  ;;  %v604_v30 = vrot.slane %v599_v16, %v1979_v26 }
  0xbc   : > { %v608_v31 = vrot.slane %v599_v16, %v1985_v34  ;;  %v616_v33 = vstv %s2003_s27  ;;  %v620_v35 = vstv %s2005_s26  ;;  %v582_v36 = vadd.f32 %v580_v15, %v576_v24  ;;  %s2084_s27 = sld [smem:[#allocation8 + $0x33]] }
  0xbd   : > { %v583_v37 = vadd.f32 %v581_v19, %v577_v25  ;;  %v617_v38 = vmul.f32 %v1866_v44, %v616_v33  ;;  %v618_v39 = vmul.f32 %v1869_v45, %v616_v33  ;;  %v621_v40 = vmul.f32 %v1873_v52, %v620_v35  ;;  %s2086_s26 = sld [smem:[#allocation8 + $0x3b]] }
  0xbe   : > { %v622_v41 = vmul.f32 %v1876_v55, %v620_v35  ;;  %v626_v12 = vstv %s2013_s7  ;;  %v632_v47 = vstv %s2015_s10  ;;  %v588_v48 = vadd.f32 %v586_v43, %v582_v36  ;;  %v2068_v43 = vld [vmem:[#allocation11 + $0x2] ss:$8 sm:$0x3]  ;;  %s2096_s7 = sld [smem:[#allocation8 + $0x4]] }
  0xbf   : > { %v589_v49 = vadd.f32 %v587_v22, %v583_v37  ;;  %v627_v50 = vmul.f32 %v1883_v0, %v626_v12  ;;  %v628_v51 = vmul.f32 %v1887_v3, %v626_v12  ;;  %v623_v54 = vadd.f32 %v621_v40, %v617_v38  ;;  %s2098_s10 = sld [smem:[#allocation8 + $0xc]] }
  0xc0   : > { %v624_v56 = vadd.f32 %v622_v41, %v618_v39  ;;  %v633_v58 = vmul.f32 %v1890_v4, %v632_v47  ;;  %v634_v59 = vmul.f32 %v1895_v6, %v632_v47  ;;  %v594_v60 = vadd.f32 %v592_v27, %v588_v48 }
  0xc1   : > { %v595_v61 = vadd.f32 %v593_v28, %v589_v49  ;;  %v638_v62 = vstv %s2025_s15  ;;  %v644_v63 = vstv %s2027_s13  ;;  %v629_v1 = vadd.f32 %v627_v50, %v623_v54  ;;  %s2102_s15 = sld [smem:[#allocation8 + $0x14]] }
  0xc2   : > { %v630_v2 = vadd.f32 %v628_v51, %v624_v56  ;;  %v639_v5 = vmul.f32 %v1912_v29, %v638_v62  ;;  %v640_v7 = vmul.f32 %v1917_v32, %v638_v62  ;;  %v596_v9 = vmin.f32 %v594_v60, 1.0  ;;  %s2104_s13 = sld [smem:[#allocation8 + $0x1c]] }
  0xc3   : > { %v597_v14 = vmin.f32 %v595_v61, 1.0  ;;  %v645_v15 = vmul.f32 %v1924_v42, %v644_v63  ;;  %v646_v16 = vmul.f32 %v1927_v46, %v644_v63  ;;  %v635_v17 = vadd.f32 %v633_v58, %v629_v1 }
  0xc4   : > { %v636_v18 = vadd.f32 %v634_v59, %v630_v2  ;;  %v650_v19 = vstv %s2038_s12  ;;  %v656_v20 = vstv %s2040_s30  ;;  %v549_v22 = vmul.f32 %v545_v13, %v535_v10  ;;  %s2114_s12 = sld [smem:[#allocation8 + $0x24]] }
  0xc5   : > { %v611_v23 = vmul.f32 %v604_v30, %v596_v9  ;;  %v612_v24 = vmul.f32 %v608_v31, %v597_v14  ;;  %v651_v25 = vmul.f32 %v1934_v53, %v650_v19  ;;  %v641_v27 = vadd.f32 %v639_v5, %v635_v17  ;;  %s2118_s30 = sld [smem:[#allocation8 + $0x2c]] }
  0xc6   : > { %v642_v28 = vadd.f32 %v640_v7, %v636_v18  ;;  %v652_v33 = vmul.f32 %v1940_v57, %v650_v19  ;;  %v657_v35 = vmul.f32 %v1953_v8, %v656_v20  ;;  %v658_v10 = vmul.f32 %v1959_v11, %v656_v20 }
  0xc7   : > { %v613_v36 = vadd.f32 %v611_v23, %v548_v21  ;;  %v669_v13 = vrot.slane %v2068_v43, %v1979_v26  ;;  %v673_v30 = vrot.slane %v2068_v43, %v1985_v34  ;;  %v647_v31 = vadd.f32 %v645_v15, %v641_v27 }
  0xc8   : > { %v648_v37 = vadd.f32 %v646_v16, %v642_v28  ;;  %v681_v38 = vstv %s2052_s9  ;;  %v685_v39 = vstv %s2054_s11  ;;  %v691_v49 = vstv %s2060_s18  ;;  %s2123_s9 = sld [smem:[#allocation8 + $0x34]]  ;;  %s2137_s18 = sld [smem:[#allocation8 + $0x5]] }
  0xc9   : > { %v682_v21 = vmul.f32 %v1866_v44, %v681_v38  ;;  %v683_v40 = vmul.f32 %v1869_v45, %v681_v38  ;;  %v686_v41 = vmul.f32 %v1873_v52, %v685_v39  ;;  %v687_v12 = vmul.f32 %v1876_v55, %v685_v39  ;;  %s2125_s11 = sld [smem:[#allocation8 + $0x3c]] }
  0xca   : > { %v653_v47 = vadd.f32 %v651_v25, %v647_v31  ;;  %v654_v48 = vadd.f32 %v652_v33, %v648_v37  ;;  %v697_v50 = vstv %s2062_s14  ;;  %v692_v56 = vmul.f32 %v1883_v0, %v691_v49  ;;  %v729_v25 = vld [vmem:[#allocation11 + $0x3] ss:$8 sm:$0x3]  ;;  %s2139_s14 = sld [smem:[#allocation8 + $0xd]] }
  0xcb   : > { %v688_v51 = vadd.f32 %v686_v41, %v682_v21  ;;  %v689_v54 = vadd.f32 %v687_v12, %v683_v40  ;;  %v693_v58 = vmul.f32 %v1887_v3, %v691_v49  ;;  %v698_v61 = vmul.f32 %v1890_v4, %v697_v50 }
  0xcc   : > { %v659_v59 = vadd.f32 %v657_v35, %v653_v47  ;;  %v660_v60 = vadd.f32 %v658_v10, %v654_v48  ;;  %v699_v62 = vmul.f32 %v1895_v6, %v697_v50  ;;  %v703_v2 = vstv %s2071_s19  ;;  %s2143_s19 = sld [smem:[#allocation8 + $0x15]] }
  0xcd   : > { %v694_v63 = vadd.f32 %v692_v56, %v688_v51  ;;  %v695_v1 = vadd.f32 %v693_v58, %v689_v54  ;;  %v709_v5 = vstv %s2073_s8  ;;  %v704_v14 = vmul.f32 %v1912_v29, %v703_v2  ;;  %s2145_s8 = sld [smem:[#allocation8 + $0x1d]] }
  0xce   : > { %v661_v7 = vmin.f32 %v659_v59, 1.0  ;;  %v662_v9 = vmin.f32 %v660_v60, 1.0  ;;  %v705_v15 = vmul.f32 %v1917_v32, %v703_v2  ;;  %v710_v18 = vmul.f32 %v1924_v42, %v709_v5 }
  0xcf   : > { %v700_v16 = vadd.f32 %v698_v61, %v694_v63  ;;  %v701_v17 = vadd.f32 %v699_v62, %v695_v1  ;;  %v711_v19 = vmul.f32 %v1927_v46, %v709_v5  ;;  %v715_v43 = vstv %s2084_s27  ;;  %s2154_s27 = sld [smem:[#allocation8 + $0x25]] }
  0xd0   : > { %v676_v20 = vmul.f32 %v669_v13, %v661_v7  ;;  %v721_v23 = vstv %s2086_s26  ;;  %v716_v33 = vmul.f32 %v1934_v53, %v715_v43  ;;  %v717_v35 = vmul.f32 %v1940_v57, %v715_v43  ;;  %s2158_s26 = sld [smem:[#allocation8 + $0x2d]] }
  0xd1   : > { %v706_v27 = vadd.f32 %v704_v14, %v700_v16  ;;  %v707_v28 = vadd.f32 %v705_v15, %v701_v17  ;;  %v614_v10 = vadd.f32 %v612_v24, %v549_v22  ;;  %v677_v31 = vmul.f32 %v673_v30, %v662_v9 }
  0xd2   : > { %v678_v13 = vadd.f32 %v676_v20, %v613_v36  ;;  %v722_v37 = vmul.f32 %v1953_v8, %v721_v23  ;;  %v723_v21 = vmul.f32 %v1959_v11, %v721_v23  ;;  %v734_v40 = vrot.slane %v729_v25, %v1979_v26 }
  0xd3   : > { %v712_v38 = vadd.f32 %v710_v18, %v706_v27  ;;  %v713_v39 = vadd.f32 %v711_v19, %v707_v28  ;;  %v746_v41 = vstv %s2096_s7  ;;  %v750_v12 = vstv %s2098_s10  ;;  %s2168_s7 = sld [smem:[#allocation8 + $0x35]] }
  0xd4   : > { %v756_v47 = vstv %s2102_s15  ;;  %v762_v48 = vstv %s2104_s13  ;;  %v747_v24 = vmul.f32 %v1866_v44, %v746_v41  ;;  %v748_v36 = vmul.f32 %v1869_v45, %v746_v41  ;;  %s2170_s10 = sld [smem:[#allocation8 + $0x3d]]  ;;  %s2184_s15 = sld [smem:[#allocation8 + $0x6]] }
  0xd5   : > { %v718_v49 = vadd.f32 %v716_v33, %v712_v38  ;;  %v719_v22 = vadd.f32 %v717_v35, %v713_v39  ;;  %v751_v30 = vmul.f32 %v1873_v52, %v750_v12  ;;  %v752_v50 = vmul.f32 %v1876_v55, %v750_v12  ;;  %s2186_s13 = sld [smem:[#allocation8 + $0xe]] }
  0xd6   : > { %v757_v51 = vmul.f32 %v1883_v0, %v756_v47  ;;  %v758_v54 = vmul.f32 %v1887_v3, %v756_v47  ;;  %v738_v59 = vrot.slane %v729_v25, %v1985_v34  ;;  %v763_v60 = vmul.f32 %v1890_v4, %v762_v48 }
  0xd7   : > { %v724_v56 = vadd.f32 %v722_v37, %v718_v49  ;;  %v725_v58 = vadd.f32 %v723_v21, %v719_v22  ;;  %v753_v61 = vadd.f32 %v751_v30, %v747_v24  ;;  %v754_v62 = vadd.f32 %v752_v50, %v748_v36 }
  0xd8   : > { %v764_v63 = vmul.f32 %v1895_v6, %v762_v48  ;;  %v768_v1 = vstv %s2114_s12  ;;  %v679_v2 = vadd.f32 %v677_v31, %v614_v10  ;;  %v774_v9 = vstv %s2118_s30  ;;  %s2192_s12 = sld [smem:[#allocation8 + $0x16]] }
  0xd9   : > { %v726_v5 = vmin.f32 %v724_v56, 1.0  ;;  %v727_v7 = vmin.f32 %v725_v58, 1.0  ;;  %v759_v14 = vadd.f32 %v757_v51, %v753_v61  ;;  %v760_v15 = vadd.f32 %v758_v54, %v754_v62  ;;  %s2194_s30 = sld [smem:[#allocation8 + $0x1e]] }
  0xda   : > { %v769_v16 = vmul.f32 %v1912_v29, %v768_v1  ;;  %v770_v17 = vmul.f32 %v1917_v32, %v768_v1  ;;  %v780_v20 = vstv %s2123_s9  ;;  %v786_v43 = vstv %s2125_s11  ;;  %s2204_s9 = sld [smem:[#allocation8 + $0x26]] }
  0xdb   : > { %v741_v18 = vmul.f32 %v734_v40, %v726_v5  ;;  %v742_v19 = vmul.f32 %v738_v59, %v727_v7  ;;  %v765_v23 = vadd.f32 %v763_v60, %v759_v14  ;;  %v766_v25 = vadd.f32 %v764_v63, %v760_v15  ;;  %v794_v40 = vld [vmem:[#allocation11 + $0x4] ss:$8 sm:$0x3]  ;;  %s2206_s11 = sld [smem:[#allocation8 + $0x2e]] }
  0xdc   : > { %v775_v27 = vmul.f32 %v1924_v42, %v774_v9  ;;  %v776_v28 = vmul.f32 %v1927_v46, %v774_v9  ;;  %v781_v10 = vmul.f32 %v1934_v53, %v780_v20  ;;  %v782_v31 = vmul.f32 %v1940_v57, %v780_v20 }
  0xdd   : > { %v2160_v33 = vadd.f32 %v741_v18, %v678_v13  ;;  %v2162_v35 = vadd.f32 %v742_v19, %v679_v2  ;;  %v771_v37 = vadd.f32 %v769_v16, %v765_v23  ;;  %v772_v38 = vadd.f32 %v770_v17, %v766_v25 }
  0xde   : > { %v787_v39 = vmul.f32 %v1953_v8, %v786_v43  ;;  %v788_v21 = vmul.f32 %v1959_v11, %v786_v43  ;;  %v811_v41 = vstv %s2137_s18  ;;  %v815_v13 = vstv %s2139_s14  ;;  %v2200_v43 = vld [vmem:[#allocation11 + $0x5] ss:$8 sm:$0x3]  ;;  %s2218_s18 = sld [smem:[#allocation8 + $0x36]] }
  0xdf   : > { %v821_v12 = vstv %s2143_s19  ;;  %v827_v47 = vstv %s2145_s8  ;;  %v777_v48 = vadd.f32 %v775_v27, %v771_v37  ;;  %v778_v49 = vadd.f32 %v776_v28, %v772_v38  ;;  %s2220_s14 = sld [smem:[#allocation8 + $0x3e]]  ;;  %s2232_s19 = sld [smem:[#allocation8 + $0x7]] }
  0xe0   : > { %v812_v22 = vmul.f32 %v1866_v44, %v811_v41  ;;  %v813_v24 = vmul.f32 %v1869_v45, %v811_v41  ;;  %v816_v36 = vmul.f32 %v1873_v52, %v815_v13  ;;  %v817_v30 = vmul.f32 %v1876_v55, %v815_v13  ;;  %s2234_s8 = sld [smem:[#allocation8 + $0xf]] }
  0xe1   : > { %v822_v50 = vmul.f32 %v1883_v0, %v821_v12  ;;  %v823_v51 = vmul.f32 %v1887_v3, %v821_v12  ;;  %v783_v54 = vadd.f32 %v781_v10, %v777_v48  ;;  %v784_v56 = vadd.f32 %v782_v31, %v778_v49 }
  0xe2   : > { %v799_v58 = vrot.slane %v794_v40, %v1979_v26  ;;  %v828_v59 = vmul.f32 %v1890_v4, %v827_v47  ;;  %v818_v60 = vadd.f32 %v816_v36, %v812_v22  ;;  %v819_v61 = vadd.f32 %v817_v30, %v813_v24 }
  0xe3   : > { %v829_v62 = vmul.f32 %v1895_v6, %v827_v47  ;;  %v833_v63 = vstv %s2154_s27  ;;  %v789_v1 = vadd.f32 %v787_v39, %v783_v54  ;;  %v790_v2 = vadd.f32 %v788_v21, %v784_v56  ;;  %s2240_s27 = sld [smem:[#allocation8 + $0x17]] }
  0xe4   : > { %v803_v5 = vrot.slane %v794_v40, %v1985_v34  ;;  %v839_v7 = vstv %s2158_s26  ;;  %v824_v9 = vadd.f32 %v822_v50, %v818_v60  ;;  %v825_v14 = vadd.f32 %v823_v51, %v819_v61  ;;  %s2242_s26 = sld [smem:[#allocation8 + $0x1f]] }
  0xe5   : > { %v834_v15 = vmul.f32 %v1912_v29, %v833_v63  ;;  %v835_v16 = vmul.f32 %v1917_v32, %v833_v63  ;;  %v791_v17 = vmin.f32 %v789_v1, 1.0  ;;  %v792_v18 = vmin.f32 %v790_v2, 1.0 }
  0xe6   : > { %v845_v19 = vstv %s2168_s7  ;;  %v851_v20 = vstv %s2170_s10  ;;  %v830_v23 = vadd.f32 %v828_v59, %v824_v9  ;;  %v831_v25 = vadd.f32 %v829_v62, %v825_v14  ;;  %s2250_s7 = sld [smem:[#allocation8 + $0x27]] }
  0xe7   : > { %v840_v27 = vmul.f32 %v1924_v42, %v839_v7  ;;  %v841_v28 = vmul.f32 %v1927_v46, %v839_v7  ;;  %v806_v10 = vmul.f32 %v799_v58, %v791_v17  ;;  %v807_v31 = vmul.f32 %v803_v5, %v792_v18  ;;  %s2252_s10 = sld [smem:[#allocation8 + $0x2f]] }
  0xe8   : > { %v846_v37 = vmul.f32 %v1934_v53, %v845_v19  ;;  %v847_v38 = vmul.f32 %v1940_v57, %v845_v19  ;;  %v836_v39 = vadd.f32 %v834_v15, %v830_v23  ;;  %v837_v21 = vadd.f32 %v835_v16, %v831_v25 }
  0xe9   : > { %v852_v40 = vmul.f32 %v1953_v8, %v851_v20  ;;  %v853_v41 = vmul.f32 %v1959_v11, %v851_v20  ;;  %v864_v13 = vrot.slane %v2200_v43, %v1979_v26  ;;  %v868_v12 = vrot.slane %v2200_v43, %v1985_v34 }
  0xea   : > { %v876_v47 = vstv %s2184_s15  ;;  %v880_v48 = vstv %s2186_s13  ;;  %v842_v49 = vadd.f32 %v840_v27, %v836_v39  ;;  %v843_v22 = vadd.f32 %v841_v28, %v837_v21  ;;  %s2260_s15 = sld [smem:[#allocation8 + $0x37]] }
  0xeb   : > { %v877_v24 = vmul.f32 %v1866_v44, %v876_v47  ;;  %v878_v36 = vmul.f32 %v1869_v45, %v876_v47  ;;  %v881_v30 = vmul.f32 %v1873_v52, %v880_v48  ;;  %v882_v50 = vmul.f32 %v1876_v55, %v880_v48  ;;  %s2262_s13 = sld [smem:[#allocation8 + $0x3f]] }
  0xec   : > { %v886_v51 = vstv %s2192_s12  ;;  %v892_v54 = vstv %s2194_s30  ;;  %v848_v56 = vadd.f32 %v846_v37, %v842_v49  ;;  %v849_v58 = vadd.f32 %v847_v38, %v843_v22  ;;  %s1166_s12 = sshll.u32 %s1808_s29, 4 }
  0xed   : > { %v887_v59 = vmul.f32 %v1883_v0, %v886_v51  ;;  %v888_v60 = vmul.f32 %v1887_v3, %v886_v51  ;;  %v883_v61 = vadd.f32 %v881_v30, %v877_v24  ;;  %v884_v62 = vadd.f32 %v882_v50, %v878_v36 }
  0xee   : > { %v893_v63 = vmul.f32 %v1890_v4, %v892_v54  ;;  %v894_v1 = vmul.f32 %v1895_v6, %v892_v54  ;;  %v854_v2 = vadd.f32 %v852_v40, %v848_v56  ;;  %v855_v5 = vadd.f32 %v853_v41, %v849_v58  ;;  %v924_v56 = vld [vmem:[#allocation11 + $0x6] ss:$8 sm:$0x3] }
  0xef   : > { %v898_v7 = vstv %s2204_s9  ;;  %v904_v9 = vstv %s2206_s11  ;;  %v889_v14 = vadd.f32 %v887_v59, %v883_v61  ;;  %v890_v15 = vadd.f32 %v888_v60, %v884_v62  ;;  %s1296_s11 = sshll.u32 %s1637_s25, 8 }
  0xf0   : > { %v899_v16 = vmul.f32 %v1912_v29, %v898_v7  ;;  %v900_v17 = vmul.f32 %v1917_v32, %v898_v7  ;;  %v856_v18 = vmin.f32 %v854_v2, 1.0  ;;  %v857_v19 = vmin.f32 %v855_v5, 1.0 }
  0xf1   : > { %v905_v20 = vmul.f32 %v1924_v42, %v904_v9  ;;  %v906_v43 = vmul.f32 %v1927_v46, %v904_v9  ;;  %v895_v23 = vadd.f32 %v893_v63, %v889_v14  ;;  %v896_v25 = vadd.f32 %v894_v1, %v890_v15 }
  0xf2   : > { %v910_v27 = vstv %s2218_s18  ;;  %v916_v28 = vstv %s2220_s14  ;;  %v808_v37 = vadd.f32 %v806_v10, %v2160_v33  ;;  %v809_v38 = vadd.f32 %v807_v31, %v2162_v35  ;;  %s320_s18 = scalar_lea.vmem [#allocation13], %s1166_s12 }
  0xf3   : > { %v901_v39 = vadd.f32 %v899_v16, %v895_v23  ;;  %v902_v21 = vadd.f32 %v900_v17, %v896_v25  ;;  %v911_v40 = vmul.f32 %v1934_v53, %v910_v27  ;;  %v912_v41 = vmul.f32 %v1940_v57, %v910_v27  ;;  %s1036_s14 = sshll.u32 %s320_s18, 4  ;;  %s2302_s14 = int_to_ptr.vmem [resolvable:$true] %s1036_s14 }
  0xf4   : > { %v871_v47 = vmul.f32 %v864_v13, %v856_v18  ;;  %v872_v48 = vmul.f32 %v868_v12, %v857_v19  ;;  %v917_v49 = vmul.f32 %v1953_v8, %v916_v28  ;;  %v918_v33 = vmul.f32 %v1959_v11, %v916_v28  ;;  %s1488_s25 = scalar_lea.vmem %s2302_s14, 256 }
  0xf5   : > { %v907_v10 = vadd.f32 %v905_v20, %v901_v39  ;;  %v908_v35 = vadd.f32 %v906_v43, %v902_v21  ;;  %v941_v31 = vstv %s2232_s19  ;;  %v945_v22 = vstv %s2234_s8  ;;  %p1489_p10 = scmp.ne.s32.totalorder %s2302_s14, %s1488_s25 }
  0xf6   : > { %v942_v24 = vmul.f32 %v1866_v44, %v941_v31  ;;  %v943_v36 = vmul.f32 %v1869_v45, %v941_v31  ;;  %v946_v13 = vmul.f32 %v1873_v52, %v945_v22  ;;  %v947_v12 = vmul.f32 %v1876_v55, %v945_v22 }
  0xf7   : > { %v913_v30 = vadd.f32 %v911_v40, %v907_v10  ;;  %v914_v50 = vadd.f32 %v912_v41, %v908_v35  ;;  %v951_v51 = vstv %s2240_s27  ;;  %v957_v54 = vstv %s2242_s26  ;;  %s2300_s27 = scalar_lea.hbm %s2350_s6, %s1296_s11  ;;  %s1022_s26 = scalar_lea.sflag [#allocation4], %s1808_s29 }
  0xf8   : > { %v948_v58 = vadd.f32 %v946_v13, %v942_v24  ;;  %v949_v59 = vadd.f32 %v947_v12, %v943_v36  ;;  %v952_v60 = vmul.f32 %v1883_v0, %v951_v51  ;;  %v953_v61 = vmul.f32 %v1887_v3, %v951_v51  ;;  %p1490_p1 = pnand %p1489_p10, %p1744_p4 }
  0xf9   : > { %v919_v44 = vadd.f32 %v917_v49, %v913_v30  ;;  %v920_v62 = vadd.f32 %v918_v33, %v914_v50  ;;  %v958_v45 = vmul.f32 %v1890_v4, %v957_v54  ;;  %v959_v52 = vmul.f32 %v1895_v6, %v957_v54 }
  0xfa   : > { %v954_v55 = vadd.f32 %v952_v60, %v948_v58  ;;  %v955_v63 = vadd.f32 %v953_v61, %v949_v59  ;;  %v963_v1 = vstv %s2250_s7  ;;  %v969_v2 = vstv %s2252_s10  ;;  %p1491_p8 = pneg %p1490_p1  ;;  %s1580_s7 = smov [#allocation13]  }
  0xfb   : > { %v929_v5 = vrot.slane %v924_v56, %v1979_v26  ;;  %v933_v7 = vrot.slane %v924_v56, %v1985_v34  ;;  %v964_v0 = vmul.f32 %v1912_v29, %v963_v1  ;;  %v965_v3 = vmul.f32 %v1917_v32, %v963_v1  ;;  %s1492_s10 = sshll.u32 %s1580_s7, 4  ;;  %s1493_s10 = int_to_ptr.vmem [resolvable:$false] %s1492_s10 }
  0xfc   : > { %v960_v9 = vadd.f32 %v958_v45, %v954_v55  ;;  %v961_v14 = vadd.f32 %v959_v52, %v955_v63  ;;  %v970_v4 = vmul.f32 %v1924_v42, %v969_v2  ;;  %v971_v15 = vmul.f32 %v1927_v46, %v969_v2  ;;  %v989_v46 = vld [vmem:[#allocation11 + $0x7] ss:$8 sm:$0x3]  ;;  %p1495_p5 = scmp.lt.s32.totalorder %s2302_s14, %s1493_s10 }
  0xfd   : > { %v921_v6 = vmin.f32 %v919_v44, 1.0  ;;  %v922_v16 = vmin.f32 %v920_v62, 1.0  ;;  %v975_v17 = vstv %s2260_s15  ;;  %v981_v18 = vstv %s2262_s13  ;;  %s1494_s15 = scalar_lea.vmem %s1493_s10, 512 }
  0xfe   : > { %v966_v19 = vadd.f32 %v964_v0, %v960_v9  ;;  %v967_v20 = vadd.f32 %v965_v3, %v961_v14  ;;  %v976_v43 = vmul.f32 %v1934_v53, %v975_v17  ;;  %v977_v23 = vmul.f32 %v1940_v57, %v975_v17  ;;  %p1496_p9 = scmp.lt.s32.totalorder %s1494_s15, %s1488_s25 }
  0xff   : > { %v982_v32 = vmul.f32 %v1953_v8, %v981_v18  ;;  %v983_v27 = vmul.f32 %v1959_v11, %v981_v18  ;;  %v873_v42 = vadd.f32 %v871_v47, %v808_v37  ;;  %v874_v28 = vadd.f32 %v872_v48, %v809_v38  ;;  %v1005_v8 = vld [vmem:[%s2349_s5] sm:$0x3] }
 0x100   : > { %v972_v29 = vadd.f32 %v970_v4, %v966_v19  ;;  %v973_v25 = vadd.f32 %v971_v15, %v967_v20  ;;  %v936_v39 = vmul.f32 %v929_v5, %v921_v6  ;;  %v937_v21 = vmul.f32 %v933_v7, %v922_v16  ;;  %p1497_p13 = por %p1496_p9, %p1495_p5 }
 0x101   : > { %v994_v53 = vrot.slane %v989_v46, %v1979_v26  ;;  %v998_v57 = vrot.slane %v989_v46, %v1985_v34  ;;  %v1010_v35 = vrot.slane %v1005_v8, %v1979_v26  ;;  %v1014_v31 = vrot.slane %v1005_v8, %v1985_v34 }
 0x102   : > { %v978_v40 = vadd.f32 %v976_v43, %v972_v29  ;;  %v979_v41 = vadd.f32 %v977_v23, %v973_v25  ;;  %v938_v11 = vadd.f32 %v936_v39, %v873_v42  ;;  %v939_v37 = vadd.f32 %v937_v21, %v874_v28  ;;  %p1498_p2 = pnand %p1497_p13, %p1491_p8 }
 0x104   : > { %v984_v49 = vadd.f32 %v982_v32, %v978_v40  ;;  %v985_v33 = vadd.f32 %v983_v27, %v979_v41 }
 0x106   : > { %v986_v38 = vmin.f32 %v984_v49, 1.0  ;;  %v987_v47 = vmin.f32 %v985_v33, 1.0 }
 0x108   : > { %v1001_v48 = vmul.f32 %v994_v53, %v986_v38  ;;  %v1002_v10 = vmul.f32 %v998_v57, %v987_v47 }
 0x10a   : > { %v1003_v22 = vadd.f32 %v1001_v48, %v938_v11  ;;  %v1004_v24 = vadd.f32 %v1002_v10, %v939_v37 }
 0x10c   : > { %v1017_v36 = vadd.f32 %v1010_v35, %v1003_v22  ;;  %v1018_v13 = vadd.f32 %v1014_v31, %v1004_v24 }
 0x10e   : > { %1019 = vst [vmem:[%s320_s18] sm:$0xff] %v1017_v36  ;;  %1020 = vst [vmem:[%s320_s18 + $0x8] sm:$0xff] %v1018_v13 }
 0x10f   : > { %1501 = shalt.err (!%p1498_p2)
}
 0x110   : > { %s1502_s29 = scalar_lea.hbm %s2300_s27, 256  ;;  %s1506_s30 = scalar_lea.hbm %s2350_s6, 512 }
 0x111   : > { %p1503_p6 = scmp.ne.s32.totalorder %s2300_s27, %s1502_s29  ;;  %p1507_p0 = scmp.lt.u32.totalorder %s2300_s27, %s2350_s6 }
 0x112   : > { %p1508_p3 = scmp.lt.u32.totalorder %s1506_s30, %s1502_s29  ;;  %p1510_p10 = scmp.lt.u32.totalorder %s1502_s29, %s2300_s27 }
 0x113   : > { %p1504_p12 = pnand %p1503_p6, %p1744_p4 }
 0x114   : > { %p1509_p7 = por %p1508_p3, %p1507_p0 }
 0x115   : > { %p1505_p11 = pneg %p1504_p12 }
 0x116   : > { %p1511_p1 = por %p1510_p10, %p1509_p7 }
 0x118   : > { %p1512_p8 = pnand %p1511_p1, %p1505_p11 }
 0x11a   : > { %1515 = shalt.err (!%p1512_p8)
}
 0x11b   : > { %1315 = dma.vmem_to_hbm [thread:$0]  (%p1744_p4), %s2302_s14, 256, %s2300_s27, %s1022_s26  }
 0x11c PF: > { %s1048_s18 = sand.u32 1, %s1558_s21   ;;  %p2372_p5 = scmp.ne.s32.totalorder %s2355_s28, 0 }
 0x11d   : > { %p2373_p9 = scmp.ge.s32.totalorder %s1570_s24, 2  ;;  %s1049_s19 = scalar_lea.sflag [#allocation4], %s1048_s18 }
 0x11f   : > { %p1335_p13 = pnand %p2373_p9, %p2372_p5 }
 0x121   : > { %1553 = dma.done.wait (!%p1335_p13), %s1049_s19, 256  }
 0x122   : > { %1555 = vsyncadd (!%p1335_p13), %s1049_s19, 4294967040  ;;  %p23_p2 = scmp.ge.s32.totalorder %s1734_s20, 4   ;;  %s2374_s21 = smov %s1562_s22 }
 0x123   : > { %s2375_s22 = smov %s1566_s23  ;;  %s2376_s23 = smov %s1750_s17 }
 0x124   : > { %s2377_s24 = smov %s1734_s20  ;;  %25 = sbr.rel (!%p23_p2) target bundleno = 9 (0x9), region = 121 }
 0x12b   :  { %1054 = vsyncpa [#allocation3], 1 }
 0x12c   :  { %1056 = vsyncpa [#allocation3 + $0x1], 1 }
 0x12d   :  { %1057 = vsyncpa [#allocation12], 1 }
 0x12e   :  { %1058 = vsyncpa [#allocation4], 1 }
 0x12f   :  { %1060 = vsyncpa [#allocation4 + $0x1], 1 }
 0x130   :  { %1061 = vsyncpa [#allocation5], 1 }
 0x131   :  { %1063 = vsyncpa [#allocation5 + $0x1], 1 }
 0x132   :  { %1064 = vsyncpa [#allocation6], 1 }
 0x133   :  { %1066 = vsyncpa [#allocation6 + $0x1], 1 }
 0x134   :  { %1067 = vsyncpa [#allocation9], 1 }

</bundles_post_ra>
